<compile_context>
chip_gen: v5e
topology: v5e:2x2
jax: 0.10.0
libtpu: 0.0.40
codegen_flags: <defaults>
</compile_context>

<pallas_src>
import jax
import jax.numpy as jnp
from jax.experimental import pallas as pl
from jax.experimental.pallas import tpu as pltpu


def _round_up(x, m):
    return ((x + m - 1) // m) * m


def _vmem_tile_bytes(shape, itemsize):
    """Bytes of a VMEM buffer after (sublane, lane) padding of the last two dims."""
    shape = tuple(shape)
    if len(shape) == 1:
        shape = (1,) + shape
    *lead, s, l = shape
    sublane = {4: 8, 2: 16, 1: 32}.get(itemsize, 8)
    s_p = _round_up(max(int(s), 1), sublane)
    l_p = _round_up(max(int(l), 1), 128)
    n = 1
    for d in lead:
        n *= int(d)
    return n * s_p * l_p * itemsize


def _vmem_budget():
    """Generation-aware (budget, vmem_limit): ~92/96 MiB on v5e/v6e (128 MiB physical VMEM),
    ~44/48 MiB on v7x (64 MiB physical per TensorCore)."""
    cap = 64 * 1024 * 1024
    try:
        info = pltpu.get_tpu_info()
        cap = int(getattr(info, "vmem_capacity_bytes", cap)) or cap
    except Exception:
        pass
    vmem_limit = min(cap * 3 // 4, 100 * 1024 * 1024)
    budget = vmem_limit - 4 * 1024 * 1024
    return budget, vmem_limit


def _num_tensorcores():
    """Best-effort TensorCore-per-chip count (megacore detection); defaults to 1."""
    try:
        info = pltpu.get_tpu_info()
        for attr in ("num_tensorcores", "tensorcore_count", "num_cores", "cores_per_chip"):
            v = getattr(info, attr, None)
            if isinstance(v, int) and v >= 1:
                return v
    except Exception:
        pass
    try:
        kind = jax.devices()[0].device_kind.lower()
        if any(t in kind for t in ("v2", "v3", "v4", "v5p", "v7")):
            return 2
    except Exception:
        pass
    return 1


def make_mlp_kernel(num_layers):
    """Fused MLP-head kernel. refs = (x, W0, b0, ..., W_{L-1}^T, b_{L-1}, out)."""

    def kernel(*refs):
        x_ref = refs[0]
        o_ref = refs[-1]
        # Cast the streamed input to the MXU-native bf16 operand in-kernel (cheap VPU
        # work hidden under the DMA); no-op if the producer already emits bf16.
        h = x_ref[...].astype(jnp.bfloat16)                  # (tb, F)
        for l in range(num_layers - 1):
            w = refs[1 + 2 * l][...]                         # (fan_in, dim_p) bf16
            b = refs[2 + 2 * l][...]                         # (1, dim_p)      f32
            h = jnp.dot(h, w, preferred_element_type=jnp.float32) + b   # MXU, f32 accum
            h = jnp.maximum(h, 0.0)                          # ReLU in f32 on the VPU
            # F.dropout(..., training=False) == identity (eval-mode forward).
            h = h.astype(jnp.bfloat16)                       # bf16 operand for next matmul
        w_t = refs[1 + 2 * (num_layers - 1)][...]            # (1, dim_p) bf16 (pre-transposed)
        b_l = refs[2 + 2 * (num_layers - 1)][...]            # (1, 1)     f32
        # Final fan_out==1 layer: y[0, m] = sum_k w_t[0, k] * h[m, k]  -> lane-dense (1, tb).
        y = jax.lax.dot_general(w_t, h, (((1,), (1,)), ((), ())),
                                preferred_element_type=jnp.float32)
        o_ref[...] = y + b_l                                 # (1,1) bias broadcasts over (1, tb)

    return kernel


def prepare_params(params_f32, in_features, dim, num_layers):
    """Pad hidden dim to a multiple of 128, pre-transpose the last weight to (1, dim_p),
    cast weights to bf16 (biases stay f32).  Zero padding is numerically exact."""
    dim_p = _round_up(dim, 128)
    prepared = []
    for l in range(num_layers):
        W = params_f32[2 * l]
        b = params_f32[2 * l + 1]
        fan_in, fan_out = W.shape
        in_p = in_features if l == 0 else dim_p
        out_p = 1 if l == num_layers - 1 else dim_p
        Wp = jnp.zeros((in_p, out_p), jnp.float32).at[:fan_in, :fan_out].set(W)
        bp = jnp.zeros((1, out_p), jnp.float32).at[:, :fan_out].set(b)
        if l == num_layers - 1:
            Wp = Wp.T                                        # (1, dim_p) for the q.k^T final layer
        prepared += [Wp.astype(jnp.bfloat16), bp]
    return prepared, dim_p


def _choose_tb(batch, in_features, x_itemsize, dim_p, params, vmem_budget_bytes, num_tc):
    """Largest batch tile (multiple of 128, capped at 1024) fitting the VMEM budget,
    using hardware-padded tile sizes; only split into >=2 grid steps on dual-TC parts."""
    # Per-batch-row streaming cost:
    f_lanes = _round_up(in_features, 128)
    per_row = 2 * f_lanes * x_itemsize           # double-buffered x block (lane-padded)
    per_row += 2 * dim_p * (4 + 2)               # ~2 live (tb, dim_p) f32+bf16 activation pairs
    per_row += 2 * 8 * 4                         # (1->8 sublane, tb) f32 output block, 2 buffers
    # Resident weights/biases (constant index_map, single-buffered) + compiler slack.
    fixed = sum(_vmem_tile_bytes(p.shape, p.dtype.itemsize) for p in params)
    fixed += 2 * 1024 * 1024
    avail = vmem_budget_bytes - fixed
    if avail < 128 * per_row:
        # TODO(synk): weight-streaming (reduction-grid-axis / emit_pipeline) fallback for
        # heads whose resident weights exceed the VMEM budget (tightest on v7x's 64 MiB).
        raise NotImplementedError(
            "MLP-head weights do not fit resident in VMEM; weight-streaming path not implemented")
    tb = max(128, min((int(avail) // per_row) // 128 * 128, 1024))

    b128 = _round_up(batch, 128)
    tb = min(tb, b128)
    if num_tc >= 2 and b128 >= 256:
        # Keep at least two grid steps only when the "parallel" batch axis can actually be
        # sharded across two TensorCores (v7x-class parts); on single-TC chips an extra
        # grid step is pure per-step overhead.
        tb = min(tb, max(128, (b128 // 2) // 128 * 128))
    return tb


def linear_classifier_head(x, params_f32, in_features, dim, num_layers):
    """Eval-mode forward of LinearClassifierHead.  x: (B, in_features).  Returns (B, 1) f32."""
    assert num_layers >= 2
    B, F = x.shape
    assert F == in_features
    params, dim_p = prepare_params(params_f32, in_features, dim, num_layers)
    budget, vmem_limit = _vmem_budget()
    tb = _choose_tb(B, F, jnp.dtype(x.dtype).itemsize, dim_p, params, budget, _num_tensorcores())
    B_pad = _round_up(B, tb)

    # Keep x in its original dtype; pad only the ragged tail rows (no full bf16 copy).
    x_p = x if B_pad == B else jnp.pad(x, ((0, B_pad - B), (0, 0)))

    def run(single_buffer_weights):
        in_specs = [pl.BlockSpec((tb, F), lambda i: (i, 0))]
        for p in params:
            # Full-array blocks with a constant index_map: fetched once, resident in VMEM.
            if single_buffer_weights:
                spec = pl.BlockSpec(p.shape, lambda i: (0, 0), pipeline_mode=pl.Buffered(1))
            else:
                spec = pl.BlockSpec(p.shape, lambda i: (0, 0))
            in_specs.append(spec)
        return pl.pallas_call(
            make_mlp_kernel(num_layers),
            out_shape=jax.ShapeDtypeStruct((1, B_pad), jnp.float32),   # lane-dense output slab
            grid=(B_pad // tb,),
            in_specs=in_specs,
            out_specs=pl.BlockSpec((1, tb), lambda i: (0, i)),
            compiler_params=pltpu.CompilerParams(
                dimension_semantics=("parallel",),
                vmem_limit_bytes=int(vmem_limit),
            ),
        )(x_p, *params)

    try:
        out = run(True)    # single-buffered resident weights (reclaims one VMEM copy)
    except Exception:
        # Fallback if this jax build rejects pl.Buffered(1) on a pallas_call BlockSpec.
        out = run(False)

    return out.reshape(B_pad, 1)[:B, :]


def init_params(key, in_features, dim, num_layers):
    """nn.Linear-style init: U(-1/sqrt(fan_in), 1/sqrt(fan_in)); weights stored (fan_in, fan_out)."""
    dims = [in_features] + [dim] * (num_layers - 1) + [1]
    params = []
    for l in range(num_layers):
        fan_in, fan_out = dims[l], dims[l + 1]
        key, kw, kb = jax.random.split(key, 3)
        bound = 1.0 / (fan_in ** 0.5)
        W = jax.random.uniform(kw, (fan_in, fan_out), jnp.float32, -bound, bound)
        b = jax.random.uniform(kb, (1, fan_out), jnp.float32, -bound, bound)
        params += [W, b]
    return params


def reference_forward(x, params_f32, num_layers, *, bf16_inputs=False):
    """Pure-JAX reference of the PyTorch forward (eval mode).
    bf16_inputs=True reproduces the kernel's bf16-operand / f32-accumulation numerics."""
    h = x.astype(jnp.bfloat16) if bf16_inputs else x
    for l in range(num_layers):
        W, b = params_f32[2 * l], params_f32[2 * l + 1]
        Wc = W.astype(jnp.bfloat16) if bf16_inputs else W
        h = jnp.dot(h, Wc, preferred_element_type=jnp.float32) + b
        if l < num_layers - 1:
            h = jnp.maximum(h, 0.0)
            if bf16_inputs:
                h = h.astype(jnp.bfloat16)
    return h


if __name__ == "__main__":
    B = 200            # ragged on purpose: exercises the tail-pad path
    IN_FEATURES = 32
    DIM = 32
    NUM_LAYERS = 3
    DROPOUT_P = 0.1    # unused in eval-mode forward

    key = jax.random.PRNGKey(0)
    key, kx = jax.random.split(key)
    x = jax.random.normal(kx, (B, IN_FEATURES), jnp.float32)
    params = init_params(key, IN_FEATURES, DIM, NUM_LAYERS)

    out = linear_classifier_head(x, params, IN_FEATURES, DIM, NUM_LAYERS)
    out = jax.block_until_ready(out)
    assert out.shape == (B, 1), out.shape

    # Tight check vs a reference using the same bf16-operand / f32-accumulation math.
    ref_bf16 = reference_forward(x, params, NUM_LAYERS, bf16_inputs=True)
    assert jnp.allclose(out, ref_bf16, atol=1e-3, rtol=1e-3), "mismatch vs bf16-matched reference"

    # Sanity check vs the pure-f32 PyTorch-equivalent forward (tolerance = bf16 rounding).
    ref_f32 = reference_forward(x, params, NUM_LAYERS, bf16_inputs=False)
    assert jnp.allclose(out, ref_f32, atol=5e-2, rtol=5e-2), "mismatch vs f32 reference"

    print("KERNEL_OK")
</pallas_src>

<mosaic_0001>
module attributes {stable_mosaic.version = 11 : i64} {
  func.func @kernel(%arg0: i32, %arg1: memref<256x32xf32, #tpu.memory_space<vmem>>, %arg2: memref<32x128xbf16, #tpu.memory_space<vmem>>, %arg3: memref<1x128xf32, #tpu.memory_space<vmem>>, %arg4: memref<128x128xbf16, #tpu.memory_space<vmem>>, %arg5: memref<1x128xf32, #tpu.memory_space<vmem>>, %arg6: memref<1x128xbf16, #tpu.memory_space<vmem>>, %arg7: memref<1x1xf32, #tpu.memory_space<vmem>>, %arg8: memref<1x256xf32, #tpu.memory_space<vmem>>) attributes {dimension_semantics = [#tpu.dimension_semantics<parallel>], iteration_bounds = array<i64: 1>, scalar_prefetch = 0 : i64, scratch_operands = 0 : i64, tpu.core_type = #tpu.core_type<tc>, window_params = [{transform_indices = @transform_0, window_bounds = array<i64: 256, 32>}, {pipeline_mode = #tpu.pipeline_mode<synchronous>, transform_indices = @transform_1, window_bounds = array<i64: 32, 128>}, {pipeline_mode = #tpu.pipeline_mode<synchronous>, transform_indices = @transform_2, window_bounds = array<i64: 1, 128>}, {pipeline_mode = #tpu.pipeline_mode<synchronous>, transform_indices = @transform_3, window_bounds = array<i64: 128, 128>}, {pipeline_mode = #tpu.pipeline_mode<synchronous>, transform_indices = @transform_4, window_bounds = array<i64: 1, 128>}, {pipeline_mode = #tpu.pipeline_mode<synchronous>, transform_indices = @transform_5, window_bounds = array<i64: 1, 128>}, {pipeline_mode = #tpu.pipeline_mode<synchronous>, transform_indices = @transform_6, window_bounds = array<i64: 1, 1>}, {transform_indices = @transform_7, window_bounds = array<i64: 1, 256>}]} {
    %c0 = arith.constant 0 : index
    %c0_0 = arith.constant 0 : index
    %0 = vector.load %arg1[%c0, %c0_0] : memref<256x32xf32, #tpu.memory_space<vmem>>, vector<256x32xf32>
    %1 = arith.truncf %0 : vector<256x32xf32> to vector<256x32xbf16>
    %c0_1 = arith.constant 0 : index
    %c0_2 = arith.constant 0 : index
    %2 = vector.load %arg2[%c0_1, %c0_2] : memref<32x128xbf16, #tpu.memory_space<vmem>>, vector<32x128xbf16>
    %c0_3 = arith.constant 0 : index
    %c0_4 = arith.constant 0 : index
    %3 = vector.load %arg3[%c0_3, %c0_4] : memref<1x128xf32, #tpu.memory_space<vmem>>, vector<1x128xf32>
    %cst = arith.constant dense<0.000000e+00> : vector<256x128xf32>
    %4 = tpu.matmul %1, %2, %cst {dimension_numbers = #tpu.dot_dimension_numbers<[1], [0], [0], [1], [0, 0, 1, 1], [], []>} : vector<256x32xbf16>, vector<32x128xbf16>, vector<256x128xf32> -> vector<256x128xf32>
    %5 = vector.broadcast %3 : vector<1x128xf32> to vector<256x128xf32>
    %6 = arith.addf %4, %5 : vector<256x128xf32>
    %cst_5 = arith.constant 0.000000e+00 : f32
    %7 = vector.broadcast %cst_5 : f32 to vector<256x128xf32>
    %8 = arith.maximumf %6, %7 : vector<256x128xf32>
    %9 = arith.truncf %8 : vector<256x128xf32> to vector<256x128xbf16>
    %c0_6 = arith.constant 0 : index
    %c0_7 = arith.constant 0 : index
    %10 = vector.load %arg4[%c0_6, %c0_7] : memref<128x128xbf16, #tpu.memory_space<vmem>>, vector<128x128xbf16>
    %c0_8 = arith.constant 0 : index
    %c0_9 = arith.constant 0 : index
    %11 = vector.load %arg5[%c0_8, %c0_9] : memref<1x128xf32, #tpu.memory_space<vmem>>, vector<1x128xf32>
    %cst_10 = arith.constant dense<0.000000e+00> : vector<256x128xf32>
    %12 = tpu.matmul %9, %10, %cst_10 {dimension_numbers = #tpu.dot_dimension_numbers<[1], [0], [0], [1], [0, 0, 1, 1], [], []>} : vector<256x128xbf16>, vector<128x128xbf16>, vector<256x128xf32> -> vector<256x128xf32>
    %13 = vector.broadcast %11 : vector<1x128xf32> to vector<256x128xf32>
    %14 = arith.addf %12, %13 : vector<256x128xf32>
    %cst_11 = arith.constant 0.000000e+00 : f32
    %15 = vector.broadcast %cst_11 : f32 to vector<256x128xf32>
    %16 = arith.maximumf %14, %15 : vector<256x128xf32>
    %17 = arith.truncf %16 : vector<256x128xf32> to vector<256x128xbf16>
    %c0_12 = arith.constant 0 : index
    %c0_13 = arith.constant 0 : index
    %18 = vector.load %arg6[%c0_12, %c0_13] : memref<1x128xbf16, #tpu.memory_space<vmem>>, vector<1x128xbf16>
    %c0_14 = arith.constant 0 : index
    %c0_15 = arith.constant 0 : index
    %19 = vector.load %arg7[%c0_14, %c0_15] : memref<1x1xf32, #tpu.memory_space<vmem>>, vector<1x1xf32>
    %cst_16 = arith.constant dense<0.000000e+00> : vector<1x256xf32>
    %20 = tpu.matmul %18, %17, %cst_16 {dimension_numbers = #tpu.dot_dimension_numbers<[1], [1], [0], [0], [0, 0, 1, 0], [], []>} : vector<1x128xbf16>, vector<256x128xbf16>, vector<1x256xf32> -> vector<1x256xf32>
    %21 = vector.broadcast %19 : vector<1x1xf32> to vector<1x256xf32>
    %22 = arith.addf %20, %21 : vector<1x256xf32>
    %c0_17 = arith.constant 0 : index
    %c0_18 = arith.constant 0 : index
    %23 = vector.load %arg8[%c0_17, %c0_18] : memref<1x256xf32, #tpu.memory_space<vmem>>, vector<1x256xf32>
    tpu.vector_store %arg8[%c0_17, %c0_18], %22 {strides = array<i32>} : memref<1x256xf32, #tpu.memory_space<vmem>>, vector<1x256xf32>,
    return
  }
  func.func @transform_0(%arg0: i32) -> (i32, i32) {
    %c0_i32 = arith.constant 0 : i32
    %c0_i32_0 = arith.constant 0 : i32
    return %arg0, %c0_i32 : i32, i32
  }
  func.func @transform_1(%arg0: i32) -> (i32, i32) {
    %c0_i32 = arith.constant 0 : i32
    %c0_i32_0 = arith.constant 0 : i32
    %c0_i32_1 = arith.constant 0 : i32
    return %c0_i32, %c0_i32_0 : i32, i32
  }
  func.func @transform_2(%arg0: i32) -> (i32, i32) {
    %c0_i32 = arith.constant 0 : i32
    %c0_i32_0 = arith.constant 0 : i32
    %c0_i32_1 = arith.constant 0 : i32
    return %c0_i32, %c0_i32_0 : i32, i32
  }
  func.func @transform_3(%arg0: i32) -> (i32, i32) {
    %c0_i32 = arith.constant 0 : i32
    %c0_i32_0 = arith.constant 0 : i32
    %c0_i32_1 = arith.constant 0 : i32
    return %c0_i32, %c0_i32_0 : i32, i32
  }
  func.func @transform_4(%arg0: i32) -> (i32, i32) {
    %c0_i32 = arith.constant 0 : i32
    %c0_i32_0 = arith.constant 0 : i32
    %c0_i32_1 = arith.constant 0 : i32
    return %c0_i32, %c0_i32_0 : i32, i32
  }
  func.func @transform_5(%arg0: i32) -> (i32, i32) {
    %c0_i32 = arith.constant 0 : i32
    %c0_i32_0 = arith.constant 0 : i32
    %c0_i32_1 = arith.constant 0 : i32
    return %c0_i32, %c0_i32_0 : i32, i32
  }
  func.func @transform_6(%arg0: i32) -> (i32, i32) {
    %c0_i32 = arith.constant 0 : i32
    %c0_i32_0 = arith.constant 0 : i32
    %c0_i32_1 = arith.constant 0 : i32
    return %c0_i32, %c0_i32_0 : i32, i32
  }
  func.func @transform_7(%arg0: i32) -> (i32, i32) {
    %c0_i32 = arith.constant 0 : i32
    %c0_i32_0 = arith.constant 0 : i32
    return %c0_i32, %arg0 : i32, i32
  }
}

module attributes {stable_mosaic.version = 11 : i64} {
  func.func @kernel(%arg0: i32, %arg1: memref<256x32xf32, #tpu.memory_space<vmem>>, %arg2: memref<32x128xbf16, #tpu.memory_space<vmem>>, %arg3: memref<1x128xf32, #tpu.memory_space<vmem>>, %arg4: memref<128x128xbf16, #tpu.memory_space<vmem>>, %arg5: memref<1x128xf32, #tpu.memory_space<vmem>>, %arg6: memref<1x128xbf16, #tpu.memory_space<vmem>>, %arg7: memref<1x1xf32, #tpu.memory_space<vmem>>, %arg8: memref<1x256xf32, #tpu.memory_space<vmem>>) attributes {dimension_semantics = [#tpu.dimension_semantics<parallel>], iteration_bounds = array<i64: 1>, scalar_prefetch = 0 : i64, scratch_operands = 0 : i64, tpu.core_type = #tpu.core_type<tc>, window_params = [{transform_indices = @transform_0, window_bounds = array<i64: 256, 32>}, {pipeline_mode = #tpu.pipeline_mode<synchronous>, transform_indices = @transform_1, window_bounds = array<i64: 32, 128>}, {pipeline_mode = #tpu.pipeline_mode<synchronous>, transform_indices = @transform_2, window_bounds = array<i64: 1, 128>}, {pipeline_mode = #tpu.pipeline_mode<synchronous>, transform_indices = @transform_3, window_bounds = array<i64: 128, 128>}, {pipeline_mode = #tpu.pipeline_mode<synchronous>, transform_indices = @transform_4, window_bounds = array<i64: 1, 128>}, {pipeline_mode = #tpu.pipeline_mode<synchronous>, transform_indices = @transform_5, window_bounds = array<i64: 1, 128>}, {pipeline_mode = #tpu.pipeline_mode<synchronous>, transform_indices = @transform_6, window_bounds = array<i64: 1, 1>}, {transform_indices = @transform_7, window_bounds = array<i64: 1, 256>}]} {
    %c0 = arith.constant 0 : index
    %c0_0 = arith.constant 0 : index
    %0 = vector.load %arg1[%c0, %c0_0] : memref<256x32xf32, #tpu.memory_space<vmem>>, vector<256x32xf32>
    %1 = arith.truncf %0 : vector<256x32xf32> to vector<256x32xbf16>
    %c0_1 = arith.constant 0 : index
    %c0_2 = arith.constant 0 : index
    %2 = vector.load %arg2[%c0_1, %c0_2] : memref<32x128xbf16, #tpu.memory_space<vmem>>, vector<32x128xbf16>
    %c0_3 = arith.constant 0 : index
    %c0_4 = arith.constant 0 : index
    %3 = vector.load %arg3[%c0_3, %c0_4] : memref<1x128xf32, #tpu.memory_space<vmem>>, vector<1x128xf32>
    %cst = arith.constant dense<0.000000e+00> : vector<256x128xf32>
    %4 = tpu.matmul %1, %2, %cst {dimension_numbers = #tpu.dot_dimension_numbers<[1], [0], [0], [1], [0, 0, 1, 1], [], []>} : vector<256x32xbf16>, vector<32x128xbf16>, vector<256x128xf32> -> vector<256x128xf32>
    %5 = vector.broadcast %3 : vector<1x128xf32> to vector<256x128xf32>
    %6 = arith.addf %4, %5 : vector<256x128xf32>
    %cst_5 = arith.constant 0.000000e+00 : f32
    %7 = vector.broadcast %cst_5 : f32 to vector<256x128xf32>
    %8 = arith.maximumf %6, %7 : vector<256x128xf32>
    %9 = arith.truncf %8 : vector<256x128xf32> to vector<256x128xbf16>
    %c0_6 = arith.constant 0 : index
    %c0_7 = arith.constant 0 : index
    %10 = vector.load %arg4[%c0_6, %c0_7] : memref<128x128xbf16, #tpu.memory_space<vmem>>, vector<128x128xbf16>
    %c0_8 = arith.constant 0 : index
    %c0_9 = arith.constant 0 : index
    %11 = vector.load %arg5[%c0_8, %c0_9] : memref<1x128xf32, #tpu.memory_space<vmem>>, vector<1x128xf32>
    %cst_10 = arith.constant dense<0.000000e+00> : vector<256x128xf32>
    %12 = tpu.matmul %9, %10, %cst_10 {dimension_numbers = #tpu.dot_dimension_numbers<[1], [0], [0], [1], [0, 0, 1, 1], [], []>} : vector<256x128xbf16>, vector<128x128xbf16>, vector<256x128xf32> -> vector<256x128xf32>
    %13 = vector.broadcast %11 : vector<1x128xf32> to vector<256x128xf32>
    %14 = arith.addf %12, %13 : vector<256x128xf32>
    %cst_11 = arith.constant 0.000000e+00 : f32
    %15 = vector.broadcast %cst_11 : f32 to vector<256x128xf32>
    %16 = arith.maximumf %14, %15 : vector<256x128xf32>
    %17 = arith.truncf %16 : vector<256x128xf32> to vector<256x128xbf16>
    %c0_12 = arith.constant 0 : index
    %c0_13 = arith.constant 0 : index
    %18 = vector.load %arg6[%c0_12, %c0_13] : memref<1x128xbf16, #tpu.memory_space<vmem>>, vector<1x128xbf16>
    %c0_14 = arith.constant 0 : index
    %c0_15 = arith.constant 0 : index
    %19 = vector.load %arg7[%c0_14, %c0_15] : memref<1x1xf32, #tpu.memory_space<vmem>>, vector<1x1xf32>
    %cst_16 = arith.constant dense<0.000000e+00> : vector<1x256xf32>
    %20 = tpu.matmul %18, %17, %cst_16 {dimension_numbers = #tpu.dot_dimension_numbers<[1], [1], [0], [0], [0, 0, 1, 0], [], []>} : vector<1x128xbf16>, vector<256x128xbf16>, vector<1x256xf32> -> vector<1x256xf32>
    %21 = vector.broadcast %19 : vector<1x1xf32> to vector<1x256xf32>
    %22 = arith.addf %20, %21 : vector<1x256xf32>
    %c0_17 = arith.constant 0 : index
    %c0_18 = arith.constant 0 : index
    %23 = vector.load %arg8[%c0_17, %c0_18] : memref<1x256xf32, #tpu.memory_space<vmem>>, vector<1x256xf32>
    tpu.vector_store %arg8[%c0_17, %c0_18], %22 {strides = array<i32>} : memref<1x256xf32, #tpu.memory_space<vmem>>, vector<1x256xf32>,
    return
  }
  func.func @transform_0(%arg0: i32) -> (i32, i32) {
    %c0_i32 = arith.constant 0 : i32
    %c0_i32_0 = arith.constant 0 : i32
    return %arg0, %c0_i32 : i32, i32
  }
  func.func @transform_1(%arg0: i32) -> (i32, i32) {
    %c0_i32 = arith.constant 0 : i32
    %c0_i32_0 = arith.constant 0 : i32
    %c0_i32_1 = arith.constant 0 : i32
    return %c0_i32, %c0_i32_0 : i32, i32
  }
  func.func @transform_2(%arg0: i32) -> (i32, i32) {
    %c0_i32 = arith.constant 0 : i32
    %c0_i32_0 = arith.constant 0 : i32
    %c0_i32_1 = arith.constant 0 : i32
    return %c0_i32, %c0_i32_0 : i32, i32
  }
  func.func @transform_3(%arg0: i32) -> (i32, i32) {
    %c0_i32 = arith.constant 0 : i32
    %c0_i32_0 = arith.constant 0 : i32
    %c0_i32_1 = arith.constant 0 : i32
    return %c0_i32, %c0_i32_0 : i32, i32
  }
  func.func @transform_4(%arg0: i32) -> (i32, i32) {
    %c0_i32 = arith.constant 0 : i32
    %c0_i32_0 = arith.constant 0 : i32
    %c0_i32_1 = arith.constant 0 : i32
    return %c0_i32, %c0_i32_0 : i32, i32
  }
  func.func @transform_5(%arg0: i32) -> (i32, i32) {
    %c0_i32 = arith.constant 0 : i32
    %c0_i32_0 = arith.constant 0 : i32
    %c0_i32_1 = arith.constant 0 : i32
    return %c0_i32, %c0_i32_0 : i32, i32
  }
  func.func @transform_6(%arg0: i32) -> (i32, i32) {
    %c0_i32 = arith.constant 0 : i32
    %c0_i32_0 = arith.constant 0 : i32
    %c0_i32_1 = arith.constant 0 : i32
    return %c0_i32, %c0_i32_0 : i32, i32
  }
  func.func @transform_7(%arg0: i32) -> (i32, i32) {
    %c0_i32 = arith.constant 0 : i32
    %c0_i32_0 = arith.constant 0 : i32
    return %c0_i32, %arg0 : i32, i32
  }
}

</mosaic_0001>

<bundles_post_ra>
// kernel: tpu_custom_call.1
= control target key start
LH: loop header
LB: loop body
LE: loop exit
PB: predicated region body
PF: predicated region fallthrough
CT: control target
= control target key end

     0   :  { %s933_s0 = inlined_call_operand.vmem [shape: f32[256,32], index: 0, kind: input, shape index: {}]   ;;  %s934_s1 = inlined_call_operand.vmem [shape: bf16[32,128], index: 1, kind: input, shape index: {}]   ;;  %s935_s2 = inlined_call_operand.vmem [shape: f32[1,128], index: 2, kind: input, shape index: {}]   ;;  %s936_s3 = inlined_call_operand.vmem [shape: bf16[128,128], index: 3, kind: input, shape index: {}]   ;;  %s937_s4 = inlined_call_operand.vmem [shape: f32[1,128], index: 4, kind: input, shape index: {}]   ;;  %s938_s5 = inlined_call_operand.vmem [shape: bf16[1,128], index: 5, kind: input, shape index: {}]   ;;  %s939_s6 = inlined_call_operand.<no memory space> [shape: f32[1,1], index: 6, kind: input, shape index: {}]   ;;  %s940_s7 = inlined_call_operand.hbm [shape: f32[1,256], index: 7, kind: output, shape index: {}]  }
   0x1   :  { %v12_v0 = vstv %s939_s6 }
   0x2   :  { %13 = vst [vmem:[#allocation2] sm:$0x1] %v12_v0 }
   0x3   :  { %v607_v1 = vld [vmem:[%s934_s1 + $0x8] sm:$0xff]  ;;  %v606_v2 = vld [vmem:[%s934_s1] sm:$0xff] }
   0x4   :  { %153 = vmatpush.bf16.msra.mxu0 %v607_v1  ;;  %v30_v3 = vld [vmem:[%s933_s0] sm:$0xff]  ;;  %v31_v4 = vld [vmem:[%s933_s0 + $0x8] sm:$0xff]  ;;  %616 = vmatpush.bf16.msra.mxu3 %v607_v1 }
   0x5   :  { %14 = vsyncpa [#allocation4], 0  ;;  %v62_v5 = vpack.c.bf16 %v31_v4, %v30_v3  ;;  %vm98_vm0 = vcmask 261120   ;;  %v32_v6 = vld [vmem:[%s933_s0 + $0x10] sm:$0xff]  ;;  %v33_v7 = vld [vmem:[%s933_s0 + $0x18] sm:$0xff]  ;;  %s541_s14 = sshll.u32 %s940_s7, 4  ;;  %s542_s14 = int_to_ptr.hbm [resolvable:$true] %s541_s14 }
   0x6   :  { %v63_v8 = vpack.c.bf16 %v33_v7, %v32_v6  ;;  %v34_v9 = vld [vmem:[%s933_s0 + $0x20] sm:$0xff]  ;;  %v35_v10 = vld [vmem:[%s933_s0 + $0x28] sm:$0xff]  ;;  %v36_v12 = vld [vmem:[%s933_s0 + $0x30] sm:$0xff]  ;;  %vm526_vm1 = vcmask 1040384  }
   0x7   :  { %v64_v11 = vpack.c.bf16 %v35_v10, %v34_v9  ;;  %v37_v13 = vld [vmem:[%s933_s0 + $0x38] sm:$0xff]  ;;  %v38_v15 = vld [vmem:[%s933_s0 + $0x40] sm:$0xff]  ;;  %v39_v16 = vld [vmem:[%s933_s0 + $0x48] sm:$0xff] }
   0x8   :  { %154 = vmatpush.bf16.msra.mxu0 %v606_v2  ;;  %617 = vmatpush.bf16.msra.mxu3 %v606_v2  ;;  %v65_v14 = vpack.c.bf16 %v37_v13, %v36_v12  ;;  %v66_v17 = vpack.c.bf16 %v39_v16, %v38_v15  ;;  %v615_v18 = vld [vmem:[%s936_s3 + $0x38] sm:$0xff]  ;;  %v40_v19 = vld [vmem:[%s933_s0 + $0x50] sm:$0xff]  ;;  %v613_v23 = vld [vmem:[%s936_s3 + $0x28] sm:$0xff] }
   0x9   :  { %352 = vmatpush.bf16.msra.mxu1 %v615_v18  ;;  %618 = vmatpush.bf16.msra.mxu2 %v615_v18  ;;  %v41_v20 = vld [vmem:[%s933_s0 + $0x58] sm:$0xff]  ;;  %v614_v22 = vld [vmem:[%s936_s3 + $0x30] sm:$0xff]  ;;  %v612_v24 = vld [vmem:[%s936_s3 + $0x20] sm:$0xff] }
   0xa   :  { %v67_v21 = vpack.c.bf16 %v41_v20, %v40_v19  ;;  %v42_v25 = vld [vmem:[%s933_s0 + $0x60] sm:$0xff]  ;;  %v43_v26 = vld [vmem:[%s933_s0 + $0x68] sm:$0xff]  ;;  %v611_v27 = vld [vmem:[%s936_s3 + $0x18] sm:$0xff] }
   0xb   :  { %558 = vmatmul.msk.bf16.vlgmr.msra.gmra.mxu0 %vm98_vm0, %v62_v5  ;;  %v68_v28 = vpack.c.bf16 %v43_v26, %v42_v25  ;;  %v610_v29 = vld [vmem:[%s936_s3 + $0x10] sm:$0xff]  ;;  %v609_v30 = vld [vmem:[%s936_s3 + $0x8] sm:$0xff]  ;;  %v608_v31 = vld [vmem:[%s936_s3] sm:$0xff] }
   0xc   :  { %v44_v32 = vld [vmem:[%s933_s0 + $0x70] sm:$0xff]  ;;  %v45_v33 = vld [vmem:[%s933_s0 + $0x78] sm:$0xff]  ;;  %v50_v35 = vld [vmem:[%s933_s0 + $0xa0] sm:$0xff] }
   0xd   :  { %353 = vmatpush.bf16.msra.mxu1 %v614_v22  ;;  %619 = vmatpush.bf16.msra.mxu2 %v614_v22  ;;  %v69_v34 = vpack.c.bf16 %v45_v33, %v44_v32  ;;  %v51_v36 = vld [vmem:[%s933_s0 + $0xa8] sm:$0xff]  ;;  %v46_v38 = vld [vmem:[%s933_s0 + $0x80] sm:$0xff]  ;;  %v52_v42 = vld [vmem:[%s933_s0 + $0xb0] sm:$0xff] }
   0xe   :  { %v72_v37 = vpack.c.bf16 %v51_v36, %v50_v35  ;;  %v47_v39 = vld [vmem:[%s933_s0 + $0x88] sm:$0xff]  ;;  %v53_v43 = vld [vmem:[%s933_s0 + $0xb8] sm:$0xff]  ;;  %v810_v44 = vld [vmem:[%s935_s2] ss:$0 sm:$0xff] }
   0xf   :  { %v70_v40 = vpack.c.bf16 %v47_v39, %v46_v38  ;;  %v73_v45 = vpack.c.bf16 %v53_v43, %v52_v42  ;;  %v48_v51 = vld [vmem:[%s933_s0 + $0x90] sm:$0xff]  ;;  %v49_v52 = vld [vmem:[%s933_s0 + $0x98] sm:$0xff]  ;;  %v54_v56 = vld [vmem:[%s933_s0 + $0xc0] sm:$0xff] }
  0x10   :  { %568 = vmatmul.msk.bf16.vlgmr.msra.gmra.mxu3 %vm98_vm0, %v72_v37  ;;  %v71_v54 = vpack.c.bf16 %v49_v52, %v48_v51  ;;  %v55_v57 = vld [vmem:[%s933_s0 + $0xc8] sm:$0xff]  ;;  %v56_v2 = vld [vmem:[%s933_s0 + $0xd0] sm:$0xff]  ;;  %v57_v3 = vld [vmem:[%s933_s0 + $0xd8] sm:$0xff] }
  0x11   :  { %354 = vmatpush.bf16.msra.mxu1 %v613_v23  ;;  %620 = vmatpush.bf16.msra.mxu2 %v613_v23  ;;  %v74_v58 = vpack.c.bf16 %v55_v57, %v54_v56  ;;  %v75_v4 = vpack.c.bf16 %v57_v3, %v56_v2  ;;  %v58_v12 = vld [vmem:[%s933_s0 + $0xe0] sm:$0xff]  ;;  %v59_v13 = vld [vmem:[%s933_s0 + $0xe8] sm:$0xff]  ;;  %v60_v22 = vld [vmem:[%s933_s0 + $0xf0] sm:$0xff] }
  0x12   :  { %v61_v23 = vld [vmem:[%s933_s0 + $0xf8] sm:$0xff] }
  0x15   :  { %355 = vmatpush.bf16.msra.mxu1 %v612_v24  ;;  %621 = vmatpush.bf16.msra.mxu2 %v612_v24  ;;  %v77_v24 = vpack.c.bf16 %v61_v23, %v60_v22 }
  0x19   :  { %356 = vmatpush.bf16.msra.mxu1 %v611_v27  ;;  %622 = vmatpush.bf16.msra.mxu2 %v611_v27 }
  0x1b   :  { %559 = vmatmul.msk.bf16.gmra.mxu0 %vm98_vm0, %v63_v8 }
  0x1d   :  { %357 = vmatpush.bf16.msra.mxu1 %v610_v29  ;;  %623 = vmatpush.bf16.msra.mxu2 %v610_v29 }
  0x20   :  { %569 = vmatmul.msk.bf16.gmra.mxu3 %vm98_vm0, %v73_v45 }
  0x21   :  { %358 = vmatpush.bf16.msra.mxu1 %v609_v30  ;;  %624 = vmatpush.bf16.msra.mxu2 %v609_v30 }
  0x25   :  { %359 = vmatpush.bf16.msra.mxu1 %v608_v31  ;;  %625 = vmatpush.bf16.msra.mxu2 %v608_v31 }
  0x2b   :  { %560 = vmatmul.msk.bf16.gmra.mxu0 %vm98_vm0, %v64_v11 }
  0x30   :  { %570 = vmatmul.msk.bf16.gmra.mxu3 %vm98_vm0, %v74_v58 }
  0x3b   :  { %561 = vmatmul.msk.bf16.gmra.mxu0 %vm98_vm0, %v65_v14  ;;  %v76_v14 = vpack.c.bf16 %v59_v13, %v58_v12 }
  0x40   :  { %571 = vmatmul.msk.bf16.gmra.mxu3 %vm98_vm0, %v75_v4 }
  0x4b   :  { %562 = vmatmul.msk.bf16.gmra.mxu0 %vm98_vm0, %v66_v17 }
  0x50   :  { %572 = vmatmul.msk.bf16.gmra.mxu3 %vm98_vm0, %v76_v14 }
  0x5b   :  { %563 = vmatmul.msk.bf16.gmra.mxu0 %vm98_vm0, %v67_v21 }
  0x60   :  { %573 = vmatmul.msk.bf16.gmra.mxu3 %vm98_vm0, %v77_v24 }
  0x6b   :  { %564 = vmatmul.msk.bf16.gmra.mxu0 %vm98_vm0, %v68_v28 }
  0x7b   :  { %565 = vmatmul.msk.bf16.gmra.mxu0 %vm98_vm0, %v69_v34 }
  0x88   :  { %v156_v41 = vpop.f32.mrf.mxu0 }
  0x89   :  { %v157_v46 = vadd.f32 %v810_v44, %v156_v41 }
  0x8b   :  { %566 = vmatmul.msk.bf16.gmra.mxu0 %vm98_vm0, %v70_v40  ;;  %v236_v49 = vmax.f32 %v157_v46, 0.0 }
  0x90   :  { %v158_v47 = vpop.f32.mrf.mxu0 }
  0x91   :  { %v159_v48 = vadd.f32 %v810_v44, %v158_v47 }
  0x93   :  { %v237_v50 = vmax.f32 %v159_v48, 0.0 }
  0x95   :  { %v268_v53 = vpack.c.bf16 %v237_v50, %v236_v49 }
  0x97   :  { %360 = vmatmul.bf16.vlgmr.msra.gmra.mxu1 %v268_v53 }
  0x98   :  { %v161_v55 = vpop.f32.mrf.mxu0 }
  0x99   :  { %v162_v59 = vadd.f32 %v810_v44, %v161_v55 }
  0x9b   :  { %567 = vmatmul.msk.bf16.gmra.mxu0 %vm98_vm0, %v71_v54  ;;  %v238_v62 = vmax.f32 %v162_v59, 0.0  ;;  %v206_v54 = vpop.f32.mrf.mxu3 }
  0xa0   :  { %v163_v60 = vpop.f32.mrf.mxu0 }
  0xa1   :  { %v164_v61 = vadd.f32 %v810_v44, %v163_v60 }
  0xa3   :  { %v239_v63 = vmax.f32 %v164_v61, 0.0 }
  0xa5   :  { %v269_v0 = vpack.c.bf16 %v239_v63, %v238_v62  ;;  %v208_v62 = vpop.f32.mrf.mxu3  ;;  %v870_v63 = vld [vmem:[%s937_s4] ss:$0 sm:$0xff] }
  0xa7   :  { %365 = vmatmul.bf16.gmra.mxu1 %v269_v0 }
  0xa8   :  { %v166_v1 = vpop.f32.mrf.mxu0 }
  0xa9   :  { %v167_v5 = vadd.f32 %v810_v44, %v166_v1 }
  0xab   :  { %v240_v8 = vmax.f32 %v167_v5, 0.0 }
  0xb0   :  { %v168_v6 = vpop.f32.mrf.mxu0 }
  0xb1   :  { %v169_v7 = vadd.f32 %v810_v44, %v168_v6 }
  0xb3   :  { %v241_v9 = vmax.f32 %v169_v7, 0.0 }
  0xb5   :  { %v270_v10 = vpack.c.bf16 %v241_v9, %v240_v8  ;;  %v211_v8 = vpop.f32.mrf.mxu3 }
  0xb7   :  { %370 = vmatmul.bf16.gmra.mxu1 %v270_v10 }
  0xb8   :  { %v171_v11 = vpop.f32.mrf.mxu0 }
  0xb9   :  { %v172_v15 = vadd.f32 %v810_v44, %v171_v11 }
  0xbb   :  { %v242_v18 = vmax.f32 %v172_v15, 0.0 }
  0xbd   :  { %v213_v15 = vpop.f32.mrf.mxu3 }
  0xc0   :  { %v173_v16 = vpop.f32.mrf.mxu0 }
  0xc1   :  { %v174_v17 = vadd.f32 %v810_v44, %v173_v16 }
  0xc3   :  { %v243_v19 = vmax.f32 %v174_v17, 0.0 }
  0xc5   :  { %v271_v20 = vpack.c.bf16 %v243_v19, %v242_v18  ;;  %v207_v18 = vadd.f32 %v810_v44, %v206_v54  ;;  %v209_v19 = vadd.f32 %v810_v44, %v208_v62 }
  0xc7   :  { %375 = vmatmul.bf16.gmra.mxu1 %v271_v20  ;;  %v256_v23 = vmax.f32 %v207_v18, 0.0  ;;  %v257_v24 = vmax.f32 %v209_v19, 0.0 }
  0xc8   :  { %v176_v21 = vpop.f32.mrf.mxu0 }
  0xc9   :  { %v177_v25 = vadd.f32 %v810_v44, %v176_v21 }
  0xcb   :  { %v244_v28 = vmax.f32 %v177_v25, 0.0 }
  0xd0   :  { %v178_v26 = vpop.f32.mrf.mxu0 }
  0xd1   :  { %v179_v27 = vadd.f32 %v810_v44, %v178_v26 }
  0xd3   :  { %v245_v29 = vmax.f32 %v179_v27, 0.0  ;;  %v216_v27 = vpop.f32.mrf.mxu3 }
  0xd5   :  { %v272_v30 = vpack.c.bf16 %v245_v29, %v244_v28  ;;  %v278_v28 = vpack.c.bf16 %v257_v24, %v256_v23 }
  0xd7   :  { %380 = vmatmul.bf16.gmra.mxu1 %v272_v30 }
  0xd8   :  { %v181_v31 = vpop.f32.mrf.mxu0 }
  0xd9   :  { %v182_v32 = vadd.f32 %v810_v44, %v181_v31  ;;  %v212_v31 = vadd.f32 %v810_v44, %v211_v8 }
  0xdb   :  { %v246_v35 = vmax.f32 %v182_v32, 0.0  ;;  %v214_v32 = vadd.f32 %v810_v44, %v213_v15 }
  0xe0   :  { %v183_v33 = vpop.f32.mrf.mxu0 }
  0xe1   :  { %v184_v34 = vadd.f32 %v810_v44, %v183_v33 }
  0xe3   :  { %v247_v36 = vmax.f32 %v184_v34, 0.0  ;;  %v218_v34 = vpop.f32.mrf.mxu3 }
  0xe5   :  { %v273_v37 = vpack.c.bf16 %v247_v36, %v246_v35 }
  0xe7   :  { %385 = vmatmul.bf16.gmra.mxu1 %v273_v37  ;;  %v258_v37 = vmax.f32 %v212_v31, 0.0 }
  0xe8   :  { %v186_v38 = vpop.f32.mrf.mxu0 }
  0xe9   :  { %v187_v39 = vadd.f32 %v810_v44, %v186_v38  ;;  %v259_v38 = vmax.f32 %v214_v32, 0.0 }
  0xeb   :  { %v248_v42 = vmax.f32 %v187_v39, 0.0 }
  0xf0   :  { %v188_v40 = vpop.f32.mrf.mxu0 }
  0xf1   :  { %v189_v41 = vadd.f32 %v810_v44, %v188_v40 }
  0xf3   :  { %v249_v43 = vmax.f32 %v189_v41, 0.0  ;;  %v279_v41 = vpack.c.bf16 %v259_v38, %v258_v37 }
  0xf5   :  { %v274_v45 = vpack.c.bf16 %v249_v43, %v248_v42  ;;  %v221_v42 = vpop.f32.mrf.mxu3 }
  0xf7   :  { %390 = vmatmul.bf16.gmra.mxu1 %v274_v45 }
  0xf8   :  { %v191_v46 = vpop.f32.mrf.mxu0 }
  0xf9   :  { %v192_v47 = vadd.f32 %v810_v44, %v191_v46  ;;  %v217_v46 = vadd.f32 %v810_v44, %v216_v27 }
  0xfb   :  { %v250_v50 = vmax.f32 %v192_v47, 0.0  ;;  %v219_v47 = vadd.f32 %v810_v44, %v218_v34 }
  0xfd   :  { %v223_v54 = vpop.f32.mrf.mxu3 }
 0x100   :  { %v193_v48 = vpop.f32.mrf.mxu0 }
 0x101   :  { %v194_v49 = vadd.f32 %v810_v44, %v193_v48 }
 0x103   :  { %v251_v51 = vmax.f32 %v194_v49, 0.0 }
 0x105   :  { %v275_v52 = vpack.c.bf16 %v251_v51, %v250_v50  ;;  %v260_v51 = vmax.f32 %v217_v46, 0.0 }
 0x107   :  { %395 = vmatmul.bf16.gmra.mxu1 %v275_v52  ;;  %v261_v52 = vmax.f32 %v219_v47, 0.0 }
 0x108   :  { %v196_v53 = vpop.f32.mrf.mxu0 }
 0x109   :  { %v197_v55 = vadd.f32 %v810_v44, %v196_v53 }
 0x10b   :  { %v252_v58 = vmax.f32 %v197_v55, 0.0 }
 0x110   :  { %v198_v56 = vpop.f32.mrf.mxu0 }
 0x111   :  { %v199_v57 = vadd.f32 %v810_v44, %v198_v56  ;;  %v280_v56 = vpack.c.bf16 %v261_v52, %v260_v51 }
 0x113   :  { %v253_v59 = vmax.f32 %v199_v57, 0.0 }
 0x114   :  { %v361_v60 = vpop.f32.mrf.mxu1 }
 0x115   :  { %v276_v61 = vpack.c.bf16 %v253_v59, %v252_v58  ;;  %v362_v1 = vadd.f32 %v870_v63, %v361_v60  ;;  %v226_v59 = vpop.f32.mrf.mxu3  ;;  %v222_v60 = vadd.f32 %v810_v44, %v221_v42 }
 0x117   :  { %400 = vmatmul.bf16.gmra.mxu1 %v276_v61  ;;  %v441_v4 = vmax.f32 %v362_v1, 0.0  ;;  %v224_v61 = vadd.f32 %v810_v44, %v223_v54 }
 0x118   :  { %v201_v0 = vpop.f32.mrf.mxu0 }
 0x119   :  { %v202_v5 = vadd.f32 %v810_v44, %v201_v0 }
 0x11b   :  { %v254_v11 = vmax.f32 %v202_v5, 0.0 }
 0x11c   :  { %v363_v2 = vpop.f32.mrf.mxu1 }
 0x11d   :  { %v364_v3 = vadd.f32 %v870_v63, %v363_v2  ;;  %v262_v2 = vmax.f32 %v222_v60, 0.0 }
 0x11f   :  { %v442_v6 = vmax.f32 %v364_v3, 0.0  ;;  %v263_v3 = vmax.f32 %v224_v61, 0.0 }
 0x120   :  { %v203_v7 = vpop.f32.mrf.mxu0 }
 0x121   :  { %v204_v9 = vadd.f32 %v810_v44, %v203_v7  ;;  %v876_v10 = vpack.c.bf16 %v442_v6, %v441_v4  ;;  %v281_v6 = vpack.c.bf16 %v263_v3, %v262_v2  ;;  %v228_v7 = vpop.f32.mrf.mxu3 }
 0x123   :  { %v255_v12 = vmax.f32 %v204_v9, 0.0  ;;  %v227_v9 = vadd.f32 %v810_v44, %v226_v59 }
 0x124   :  { %v366_v13 = vpop.f32.mrf.mxu1 }
 0x125   :  { %v277_v14 = vpack.c.bf16 %v255_v12, %v254_v11  ;;  %v367_v16 = vadd.f32 %v870_v63, %v366_v13  ;;  %v229_v11 = vadd.f32 %v810_v44, %v228_v7  ;;  %v264_v13 = vmax.f32 %v227_v9, 0.0 }
 0x127   :  { %405 = vmatmul.bf16.vlgmr.msra.gmra.mxu2 %v277_v14  ;;  %v443_v21 = vmax.f32 %v367_v16, 0.0  ;;  %v265_v14 = vmax.f32 %v229_v11, 0.0 }
 0x129   :  { %v231_v12 = vpop.f32.mrf.mxu3  ;;  %v282_v16 = vpack.c.bf16 %v265_v14, %v264_v13 }
 0x12a   :  { %v232_v19 = vadd.f32 %v810_v44, %v231_v12 }
 0x12c   :  { %v368_v17 = vpop.f32.mrf.mxu1 }
 0x12d   :  { %v369_v20 = vadd.f32 %v870_v63, %v368_v17 }
 0x12f   :  { %v444_v22 = vmax.f32 %v369_v20, 0.0 }
 0x131   :  { %v882_v25 = vpack.c.bf16 %v444_v22, %v443_v21  ;;  %v233_v17 = vpop.f32.mrf.mxu3  ;;  %v266_v21 = vmax.f32 %v232_v19, 0.0 }
 0x132   :  { %v234_v20 = vadd.f32 %v810_v44, %v233_v17 }
 0x134   :  { %v371_v26 = vpop.f32.mrf.mxu1  ;;  %v267_v22 = vmax.f32 %v234_v20, 0.0 }
 0x135   :  { %v372_v29 = vadd.f32 %v870_v63, %v371_v26 }
 0x136   :  { %v283_v24 = vpack.c.bf16 %v267_v22, %v266_v21 }
 0x137   :  { %410 = vmatmul.bf16.gmra.mxu2 %v278_v28  ;;  %v445_v35 = vmax.f32 %v372_v29, 0.0 }
 0x13c   :  { %v373_v30 = vpop.f32.mrf.mxu1 }
 0x13d   :  { %v374_v33 = vadd.f32 %v870_v63, %v373_v30 }
 0x13f   :  { %v446_v36 = vmax.f32 %v374_v33, 0.0 }
 0x141   :  { %v888_v39 = vpack.c.bf16 %v446_v36, %v445_v35 }
 0x144   :  { %v376_v40 = vpop.f32.mrf.mxu1 }
 0x145   :  { %v377_v43 = vadd.f32 %v870_v63, %v376_v40 }
 0x147   :  { %415 = vmatmul.bf16.gmra.mxu2 %v279_v41  ;;  %v447_v49 = vmax.f32 %v377_v43, 0.0 }
 0x14c   :  { %v378_v45 = vpop.f32.mrf.mxu1 }
 0x14d   :  { %v379_v48 = vadd.f32 %v870_v63, %v378_v45 }
 0x14f   :  { %v448_v50 = vmax.f32 %v379_v48, 0.0 }
 0x151   :  { %v476_v53 = vpack.c.bf16 %v448_v50, %v447_v49 }
 0x154   :  { %v381_v55 = vpop.f32.mrf.mxu1 }
 0x155   :  { %v382_v57 = vadd.f32 %v870_v63, %v381_v55 }
 0x157   :  { %420 = vmatmul.bf16.gmra.mxu2 %v280_v56  ;;  %v449_v0 = vmax.f32 %v382_v57, 0.0 }
 0x15c   :  { %v383_v58 = vpop.f32.mrf.mxu1 }
 0x15d   :  { %v384_v62 = vadd.f32 %v870_v63, %v383_v58 }
 0x15f   :  { %v450_v1 = vmax.f32 %v384_v62, 0.0 }
 0x161   :  { %v477_v4 = vpack.c.bf16 %v450_v1, %v449_v0 }
 0x164   :  { %v386_v5 = vpop.f32.mrf.mxu1 }
 0x165   :  { %v387_v37 = vadd.f32 %v870_v63, %v386_v5 }
 0x167   :  { %425 = vmatmul.bf16.gmra.mxu2 %v281_v6  ;;  %v451_v40 = vmax.f32 %v387_v37, 0.0 }
 0x16c   :  { %v388_v8 = vpop.f32.mrf.mxu1 }
 0x16d   :  { %v389_v35 = vadd.f32 %v870_v63, %v388_v8 }
 0x16f   :  { %v452_v38 = vmax.f32 %v389_v35, 0.0 }
 0x171   :  { %v478_v41 = vpack.c.bf16 %v452_v38, %v451_v40 }
 0x174   :  { %v391_v15 = vpop.f32.mrf.mxu1 }
 0x175   :  { %v392_v33 = vadd.f32 %v870_v63, %v391_v15 }
 0x177   :  { %430 = vmatmul.bf16.gmra.mxu2 %v282_v16  ;;  %v453_v44 = vmax.f32 %v392_v33, 0.0 }
 0x17c   :  { %v393_v18 = vpop.f32.mrf.mxu1 }
 0x17d   :  { %v394_v31 = vadd.f32 %v870_v63, %v393_v18 }
 0x17f   :  { %v454_v34 = vmax.f32 %v394_v31, 0.0 }
 0x181   :  { %v479_v36 = vpack.c.bf16 %v454_v34, %v453_v44 }
 0x184   :  { %v396_v23 = vpop.f32.mrf.mxu1 }
 0x185   :  { %v397_v26 = vadd.f32 %v870_v63, %v396_v23 }
 0x187   :  { %435 = vmatmul.bf16.gmra.mxu2 %v283_v24  ;;  %v455_v29 = vmax.f32 %v397_v26, 0.0 }
 0x18c   :  { %v398_v27 = vpop.f32.mrf.mxu1 }
 0x18d   :  { %v399_v28 = vadd.f32 %v870_v63, %v398_v27 }
 0x18f   :  { %v456_v30 = vmax.f32 %v399_v28, 0.0  ;;  %v489_v28 = vld [vmem:[%s938_s5] sm:$0x1]  ;;  %s658_s5 = smov [#allocation3]  }
 0x190   :  { %s539_s1 = sshll.u32 %s658_s5, 4  ;;  %s540_s1 = int_to_ptr.vmem [resolvable:$true] %s539_s1 }
 0x191   :  { %v480_v32 = vpack.c.bf16 %v456_v30, %v455_v29  ;;  %v490_v29 = vld [vmem:[#allocation2] sm:$0x1]  ;;  %v657_v30 = vmov 0  }
 0x192   :  { %628 = vset.pattern.permute.xlu0 %v657_v30 }
 0x193   :  { %497 = vmatpush.bf16.xpose.msrb.mxu2 %v480_v32  ;;  %493 = vperm.xlu0 %628, %v490_v29  }
 0x194   :  { %v401_v31 = vpop.f32.mrf.mxu1 }
 0x195   :  { %v402_v34 = vadd.f32 %v870_v63, %v401_v31 }
 0x197   :  { %v457_v35 = vmax.f32 %v402_v34, 0.0 }
 0x19b   :  { %498 = vmatpush.bf16.xpose.msrb.mxu2 %v479_v36 }
 0x19c   :  { %v403_v32 = vpop.f32.mrf.mxu1 }
 0x19d   :  { %v404_v33 = vadd.f32 %v870_v63, %v403_v32 }
 0x19f   :  { %v458_v44 = vmax.f32 %v404_v33, 0.0 }
 0x1a1   :  { %v481_v36 = vpack.c.bf16 %v458_v44, %v457_v35 }
 0x1a3   :  { %499 = vmatpush.bf16.xpose.msrb.mxu2 %v478_v41 }
 0x1aa   :  { %v406_v42 = vpop.f32.mrf.mxu2 }
 0x1ab   :  { %500 = vmatpush.bf16.xpose.msrb.mxu2 %v477_v4  ;;  %v407_v43 = vadd.f32 %v870_v63, %v406_v42  ;;  %v529_v42 = vlaneseq }
 0x1ad   :  { %v459_v47 = vmax.f32 %v407_v43, 0.0  ;;  %vm531_vm2 = vcmp.lt.s32.totalorder %v529_v42, 256 }
 0x1b2   :  { %v408_v45 = vpop.f32.mrf.mxu2 }
 0x1b3   :  { %v409_v46 = vadd.f32 %v870_v63, %v408_v45  ;;  %501 = vmatpush.bf16.xpose.msrb.mxu2 %v476_v53 }
 0x1b5   :  { %v460_v48 = vmax.f32 %v409_v46, 0.0 }
 0x1b7   :  { %v482_v49 = vpack.c.bf16 %v460_v48, %v459_v47 }
 0x1ba   :  { %v411_v50 = vpop.f32.mrf.mxu2 }
 0x1bb   :  { %502 = vmatpush.bf16.xpose.msrb.mxu2 %v888_v39  ;;  %v412_v51 = vadd.f32 %v870_v63, %v411_v50 }
 0x1bd   :  { %v461_v55 = vmax.f32 %v412_v51, 0.0 }
 0x1c2   :  { %v413_v52 = vpop.f32.mrf.mxu2 }
 0x1c3   :  { %v414_v54 = vadd.f32 %v870_v63, %v413_v52  ;;  %503 = vmatpush.bf16.xpose.msrb.mxu2 %v882_v25 }
 0x1c5   :  { %v462_v56 = vmax.f32 %v414_v54, 0.0 }
 0x1c7   :  { %v483_v57 = vpack.c.bf16 %v462_v56, %v461_v55 }
 0x1ca   :  { %v416_v58 = vpop.f32.mrf.mxu2 }
 0x1cb   :  { %504 = vmatpush.bf16.xpose.msrb.mxu2 %v876_v10  ;;  %v417_v53 = vadd.f32 %v870_v63, %v416_v58 }
 0x1cd   :  { %v463_v61 = vmax.f32 %v417_v53, 0.0 }
 0x1d2   :  { %v418_v59 = vpop.f32.mrf.mxu2  ;;  %505 = vmatmul.bf16.vlgmr.msrb.gmra.mxu2 %v489_v28 }
 0x1d3   :  { %v419_v60 = vadd.f32 %v870_v63, %v418_v59 }
 0x1d5   :  { %v464_v39 = vmax.f32 %v419_v60, 0.0 }
 0x1d7   :  { %v484_v62 = vpack.c.bf16 %v464_v39, %v463_v61 }
 0x1da   :  { %v421_v0 = vpop.f32.mrf.mxu2 }
 0x1db   :  { %v422_v1 = vadd.f32 %v870_v63, %v421_v0 }
 0x1dd   :  { %v465_v3 = vmax.f32 %v422_v1, 0.0 }
 0x1e2   :  { %v423_v2 = vpop.f32.mrf.mxu2 }
 0x1e3   :  { %v424_v25 = vadd.f32 %v870_v63, %v423_v2 }
 0x1e5   :  { %v466_v4 = vmax.f32 %v424_v25, 0.0 }
 0x1e7   :  { %v485_v5 = vpack.c.bf16 %v466_v4, %v465_v3 }
 0x1ea   :  { %v426_v6 = vpop.f32.mrf.mxu2 }
 0x1eb   :  { %v427_v23 = vadd.f32 %v870_v63, %v426_v6 }
 0x1ed   :  { %v467_v26 = vmax.f32 %v427_v23, 0.0 }
 0x1f2   :  { %v428_v7 = vpop.f32.mrf.mxu2 }
 0x1f3   :  { %v429_v21 = vadd.f32 %v870_v63, %v428_v7 }
 0x1f5   :  { %v468_v24 = vmax.f32 %v429_v21, 0.0 }
 0x1f7   :  { %v486_v27 = vpack.c.bf16 %v468_v24, %v467_v26 }
 0x1fa   :  { %v431_v10 = vpop.f32.mrf.mxu2 }
 0x1fb   :  { %v432_v18 = vadd.f32 %v870_v63, %v431_v10 }
 0x1fd   :  { %v469_v20 = vmax.f32 %v432_v18, 0.0 }
 0x202   :  { %v433_v8 = vpop.f32.mrf.mxu2 }
 0x203   :  { %v434_v16 = vadd.f32 %v870_v63, %v433_v8 }
 0x205   :  { %v470_v19 = vmax.f32 %v434_v16, 0.0  ;;  %v494_v40 = vpop.permute.xlu0 %493 }
 0x206   :  { %v496_v41 = vperm.slane %v494_v40, 0 }
 0x207   :  { %v487_v22 = vpack.c.bf16 %v470_v19, %v469_v20 }
 0x20a   :  { %v436_v9 = vpop.f32.mrf.mxu2 }
 0x20b   :  { %v437_v11 = vadd.f32 %v870_v63, %v436_v9 }
 0x20d   :  { %v471_v14 = vmax.f32 %v437_v11, 0.0 }
 0x212   :  { %v438_v12 = vpop.f32.mrf.mxu2 }
 0x213   :  { %v439_v13 = vadd.f32 %v870_v63, %v438_v12 }
 0x215   :  { %v472_v15 = vmax.f32 %v439_v13, 0.0 }
 0x217   :  { %v488_v17 = vpack.c.bf16 %v472_v15, %v471_v14 }
 0x219   :  { %510 = vmatpush.bf16.xpose.msrb.mxu3 %v488_v17 }
 0x221   :  { %511 = vmatpush.bf16.xpose.msrb.mxu3 %v487_v22 }
 0x229   :  { %512 = vmatpush.bf16.xpose.msrb.mxu3 %v486_v27 }
 0x231   :  { %513 = vmatpush.bf16.xpose.msrb.mxu3 %v485_v5 }
 0x239   :  { %514 = vmatpush.bf16.xpose.msrb.mxu3 %v484_v62 }
 0x241   :  { %515 = vmatpush.bf16.xpose.msrb.mxu3 %v483_v57 }
 0x249   :  { %516 = vmatpush.bf16.xpose.msrb.mxu3 %v482_v49 }
 0x251   :  { %517 = vmatpush.bf16.xpose.msrb.mxu3 %v481_v36 }
 0x255   :  { %v506_v37 = vpop.f32.mrf.mxu2 }
 0x256   :  { %v507_v63 = vadd.f32 %v506_v37, %v496_v41 }
 0x258   :  { %518 = vmatmul.bf16.vlgmr.msrb.gmra.mxu3 %v489_v28 }
 0x25d   :  { %v508_v38 = vpop.f32.mrf.mxu2 }
 0x2db   :  { %v519_v43 = vpop.f32.mrf.mxu3 }
 0x2dc   :  { %v520_v45 = vadd.f32 %v519_v43, %v496_v41 }
 0x2de   :  { %v525_v46 = vrot.slane %v520_v45, 7 }
 0x2e0   :  { %v527_v47 = vsel %vm526_vm1, %v507_v63, %v525_v46 }
 0x2e1   :  { %533 = vst.msk [vmem:[#allocation3] sm:$0x3] %vm531_vm2, %v527_v47 }
 0x2e2   :  { %544 = dma.vmem_to_hbm [thread:$0]  %s540_s1, 32, %s542_s14, [#allocation4]  }
 0x2e3   :  { %v521_v48 = vpop.f32.mrf.mxu3 }
 0x2e4   :  { %655 = dma.done.wait [#allocation4], 32  }
 0x2e5   :  { %656 = vsyncadd [#allocation4], 4294967264 }
 0x2e6   :  { %549 = vsyncpa [#allocation4], 1 }

// kernel: tpu_custom_call.1
= control target key start
LH: loop header
LB: loop body
LE: loop exit
PB: predicated region body
PF: predicated region fallthrough
CT: control target
= control target key end

     0   :  { %s933_s0 = inlined_call_operand.vmem [shape: f32[256,32], index: 0, kind: input, shape index: {}]   ;;  %s934_s1 = inlined_call_operand.vmem [shape: bf16[32,128], index: 1, kind: input, shape index: {}]   ;;  %s935_s2 = inlined_call_operand.vmem [shape: f32[1,128], index: 2, kind: input, shape index: {}]   ;;  %s936_s3 = inlined_call_operand.vmem [shape: bf16[128,128], index: 3, kind: input, shape index: {}]   ;;  %s937_s4 = inlined_call_operand.vmem [shape: f32[1,128], index: 4, kind: input, shape index: {}]   ;;  %s938_s5 = inlined_call_operand.vmem [shape: bf16[1,128], index: 5, kind: input, shape index: {}]   ;;  %s939_s6 = inlined_call_operand.<no memory space> [shape: f32[1,1], index: 6, kind: input, shape index: {}]   ;;  %s940_s7 = inlined_call_operand.hbm [shape: f32[1,256], index: 7, kind: output, shape index: {}]  }
   0x1   :  { %v12_v0 = vstv %s939_s6 }
   0x2   :  { %13 = vst [vmem:[#allocation2] sm:$0x1] %v12_v0 }
   0x3   :  { %v607_v1 = vld [vmem:[%s934_s1 + $0x8] sm:$0xff]  ;;  %v606_v2 = vld [vmem:[%s934_s1] sm:$0xff] }
   0x4   :  { %153 = vmatpush.bf16.msra.mxu0 %v607_v1  ;;  %v30_v3 = vld [vmem:[%s933_s0] sm:$0xff]  ;;  %v31_v4 = vld [vmem:[%s933_s0 + $0x8] sm:$0xff]  ;;  %616 = vmatpush.bf16.msra.mxu3 %v607_v1 }
   0x5   :  { %14 = vsyncpa [#allocation4], 0  ;;  %v62_v5 = vpack.c.bf16 %v31_v4, %v30_v3  ;;  %vm98_vm0 = vcmask 261120   ;;  %v32_v6 = vld [vmem:[%s933_s0 + $0x10] sm:$0xff]  ;;  %v33_v7 = vld [vmem:[%s933_s0 + $0x18] sm:$0xff]  ;;  %s541_s14 = sshll.u32 %s940_s7, 4  ;;  %s542_s14 = int_to_ptr.hbm [resolvable:$true] %s541_s14 }
   0x6   :  { %v63_v8 = vpack.c.bf16 %v33_v7, %v32_v6  ;;  %v34_v9 = vld [vmem:[%s933_s0 + $0x20] sm:$0xff]  ;;  %v35_v10 = vld [vmem:[%s933_s0 + $0x28] sm:$0xff]  ;;  %v36_v12 = vld [vmem:[%s933_s0 + $0x30] sm:$0xff]  ;;  %vm526_vm1 = vcmask 1040384  }
   0x7   :  { %v64_v11 = vpack.c.bf16 %v35_v10, %v34_v9  ;;  %v37_v13 = vld [vmem:[%s933_s0 + $0x38] sm:$0xff]  ;;  %v38_v15 = vld [vmem:[%s933_s0 + $0x40] sm:$0xff]  ;;  %v39_v16 = vld [vmem:[%s933_s0 + $0x48] sm:$0xff] }
   0x8   :  { %154 = vmatpush.bf16.msra.mxu0 %v606_v2  ;;  %617 = vmatpush.bf16.msra.mxu3 %v606_v2  ;;  %v65_v14 = vpack.c.bf16 %v37_v13, %v36_v12  ;;  %v66_v17 = vpack.c.bf16 %v39_v16, %v38_v15  ;;  %v615_v18 = vld [vmem:[%s936_s3 + $0x38] sm:$0xff]  ;;  %v40_v19 = vld [vmem:[%s933_s0 + $0x50] sm:$0xff]  ;;  %v613_v23 = vld [vmem:[%s936_s3 + $0x28] sm:$0xff] }
   0x9   :  { %352 = vmatpush.bf16.msra.mxu1 %v615_v18  ;;  %618 = vmatpush.bf16.msra.mxu2 %v615_v18  ;;  %v41_v20 = vld [vmem:[%s933_s0 + $0x58] sm:$0xff]  ;;  %v614_v22 = vld [vmem:[%s936_s3 + $0x30] sm:$0xff]  ;;  %v612_v24 = vld [vmem:[%s936_s3 + $0x20] sm:$0xff] }
   0xa   :  { %v67_v21 = vpack.c.bf16 %v41_v20, %v40_v19  ;;  %v42_v25 = vld [vmem:[%s933_s0 + $0x60] sm:$0xff]  ;;  %v43_v26 = vld [vmem:[%s933_s0 + $0x68] sm:$0xff]  ;;  %v611_v27 = vld [vmem:[%s936_s3 + $0x18] sm:$0xff] }
   0xb   :  { %558 = vmatmul.msk.bf16.vlgmr.msra.gmra.mxu0 %vm98_vm0, %v62_v5  ;;  %v68_v28 = vpack.c.bf16 %v43_v26, %v42_v25  ;;  %v610_v29 = vld [vmem:[%s936_s3 + $0x10] sm:$0xff]  ;;  %v609_v30 = vld [vmem:[%s936_s3 + $0x8] sm:$0xff]  ;;  %v608_v31 = vld [vmem:[%s936_s3] sm:$0xff] }
   0xc   :  { %v44_v32 = vld [vmem:[%s933_s0 + $0x70] sm:$0xff]  ;;  %v45_v33 = vld [vmem:[%s933_s0 + $0x78] sm:$0xff]  ;;  %v50_v35 = vld [vmem:[%s933_s0 + $0xa0] sm:$0xff] }
   0xd   :  { %353 = vmatpush.bf16.msra.mxu1 %v614_v22  ;;  %619 = vmatpush.bf16.msra.mxu2 %v614_v22  ;;  %v69_v34 = vpack.c.bf16 %v45_v33, %v44_v32  ;;  %v51_v36 = vld [vmem:[%s933_s0 + $0xa8] sm:$0xff]  ;;  %v46_v38 = vld [vmem:[%s933_s0 + $0x80] sm:$0xff]  ;;  %v52_v42 = vld [vmem:[%s933_s0 + $0xb0] sm:$0xff] }
   0xe   :  { %v72_v37 = vpack.c.bf16 %v51_v36, %v50_v35  ;;  %v47_v39 = vld [vmem:[%s933_s0 + $0x88] sm:$0xff]  ;;  %v53_v43 = vld [vmem:[%s933_s0 + $0xb8] sm:$0xff]  ;;  %v810_v44 = vld [vmem:[%s935_s2] ss:$0 sm:$0xff] }
   0xf   :  { %v70_v40 = vpack.c.bf16 %v47_v39, %v46_v38  ;;  %v73_v45 = vpack.c.bf16 %v53_v43, %v52_v42  ;;  %v48_v51 = vld [vmem:[%s933_s0 + $0x90] sm:$0xff]  ;;  %v49_v52 = vld [vmem:[%s933_s0 + $0x98] sm:$0xff]  ;;  %v54_v56 = vld [vmem:[%s933_s0 + $0xc0] sm:$0xff] }
  0x10   :  { %568 = vmatmul.msk.bf16.vlgmr.msra.gmra.mxu3 %vm98_vm0, %v72_v37  ;;  %v71_v54 = vpack.c.bf16 %v49_v52, %v48_v51  ;;  %v55_v57 = vld [vmem:[%s933_s0 + $0xc8] sm:$0xff]  ;;  %v56_v2 = vld [vmem:[%s933_s0 + $0xd0] sm:$0xff]  ;;  %v57_v3 = vld [vmem:[%s933_s0 + $0xd8] sm:$0xff] }
  0x11   :  { %354 = vmatpush.bf16.msra.mxu1 %v613_v23  ;;  %620 = vmatpush.bf16.msra.mxu2 %v613_v23  ;;  %v74_v58 = vpack.c.bf16 %v55_v57, %v54_v56  ;;  %v75_v4 = vpack.c.bf16 %v57_v3, %v56_v2  ;;  %v58_v12 = vld [vmem:[%s933_s0 + $0xe0] sm:$0xff]  ;;  %v59_v13 = vld [vmem:[%s933_s0 + $0xe8] sm:$0xff]  ;;  %v60_v22 = vld [vmem:[%s933_s0 + $0xf0] sm:$0xff] }
  0x12   :  { %v61_v23 = vld [vmem:[%s933_s0 + $0xf8] sm:$0xff] }
  0x15   :  { %355 = vmatpush.bf16.msra.mxu1 %v612_v24  ;;  %621 = vmatpush.bf16.msra.mxu2 %v612_v24  ;;  %v77_v24 = vpack.c.bf16 %v61_v23, %v60_v22 }
  0x19   :  { %356 = vmatpush.bf16.msra.mxu1 %v611_v27  ;;  %622 = vmatpush.bf16.msra.mxu2 %v611_v27 }
  0x1b   :  { %559 = vmatmul.msk.bf16.gmra.mxu0 %vm98_vm0, %v63_v8 }
  0x1d   :  { %357 = vmatpush.bf16.msra.mxu1 %v610_v29  ;;  %623 = vmatpush.bf16.msra.mxu2 %v610_v29 }
  0x20   :  { %569 = vmatmul.msk.bf16.gmra.mxu3 %vm98_vm0, %v73_v45 }
  0x21   :  { %358 = vmatpush.bf16.msra.mxu1 %v609_v30  ;;  %624 = vmatpush.bf16.msra.mxu2 %v609_v30 }
  0x25   :  { %359 = vmatpush.bf16.msra.mxu1 %v608_v31  ;;  %625 = vmatpush.bf16.msra.mxu2 %v608_v31 }
  0x2b   :  { %560 = vmatmul.msk.bf16.gmra.mxu0 %vm98_vm0, %v64_v11 }
  0x30   :  { %570 = vmatmul.msk.bf16.gmra.mxu3 %vm98_vm0, %v74_v58 }
  0x3b   :  { %561 = vmatmul.msk.bf16.gmra.mxu0 %vm98_vm0, %v65_v14  ;;  %v76_v14 = vpack.c.bf16 %v59_v13, %v58_v12 }
  0x40   :  { %571 = vmatmul.msk.bf16.gmra.mxu3 %vm98_vm0, %v75_v4 }
  0x4b   :  { %562 = vmatmul.msk.bf16.gmra.mxu0 %vm98_vm0, %v66_v17 }
  0x50   :  { %572 = vmatmul.msk.bf16.gmra.mxu3 %vm98_vm0, %v76_v14 }
  0x5b   :  { %563 = vmatmul.msk.bf16.gmra.mxu0 %vm98_vm0, %v67_v21 }
  0x60   :  { %573 = vmatmul.msk.bf16.gmra.mxu3 %vm98_vm0, %v77_v24 }
  0x6b   :  { %564 = vmatmul.msk.bf16.gmra.mxu0 %vm98_vm0, %v68_v28 }
  0x7b   :  { %565 = vmatmul.msk.bf16.gmra.mxu0 %vm98_vm0, %v69_v34 }
  0x88   :  { %v156_v41 = vpop.f32.mrf.mxu0 }
  0x89   :  { %v157_v46 = vadd.f32 %v810_v44, %v156_v41 }
  0x8b   :  { %566 = vmatmul.msk.bf16.gmra.mxu0 %vm98_vm0, %v70_v40  ;;  %v236_v49 = vmax.f32 %v157_v46, 0.0 }
  0x90   :  { %v158_v47 = vpop.f32.mrf.mxu0 }
  0x91   :  { %v159_v48 = vadd.f32 %v810_v44, %v158_v47 }
  0x93   :  { %v237_v50 = vmax.f32 %v159_v48, 0.0 }
  0x95   :  { %v268_v53 = vpack.c.bf16 %v237_v50, %v236_v49 }
  0x97   :  { %360 = vmatmul.bf16.vlgmr.msra.gmra.mxu1 %v268_v53 }
  0x98   :  { %v161_v55 = vpop.f32.mrf.mxu0 }
  0x99   :  { %v162_v59 = vadd.f32 %v810_v44, %v161_v55 }
  0x9b   :  { %567 = vmatmul.msk.bf16.gmra.mxu0 %vm98_vm0, %v71_v54  ;;  %v238_v62 = vmax.f32 %v162_v59, 0.0  ;;  %v206_v54 = vpop.f32.mrf.mxu3 }
  0xa0   :  { %v163_v60 = vpop.f32.mrf.mxu0 }
  0xa1   :  { %v164_v61 = vadd.f32 %v810_v44, %v163_v60 }
  0xa3   :  { %v239_v63 = vmax.f32 %v164_v61, 0.0 }
  0xa5   :  { %v269_v0 = vpack.c.bf16 %v239_v63, %v238_v62  ;;  %v208_v62 = vpop.f32.mrf.mxu3  ;;  %v870_v63 = vld [vmem:[%s937_s4] ss:$0 sm:$0xff] }
  0xa7   :  { %365 = vmatmul.bf16.gmra.mxu1 %v269_v0 }
  0xa8   :  { %v166_v1 = vpop.f32.mrf.mxu0 }
  0xa9   :  { %v167_v5 = vadd.f32 %v810_v44, %v166_v1 }
  0xab   :  { %v240_v8 = vmax.f32 %v167_v5, 0.0 }
  0xb0   :  { %v168_v6 = vpop.f32.mrf.mxu0 }
  0xb1   :  { %v169_v7 = vadd.f32 %v810_v44, %v168_v6 }
  0xb3   :  { %v241_v9 = vmax.f32 %v169_v7, 0.0 }
  0xb5   :  { %v270_v10 = vpack.c.bf16 %v241_v9, %v240_v8  ;;  %v211_v8 = vpop.f32.mrf.mxu3 }
  0xb7   :  { %370 = vmatmul.bf16.gmra.mxu1 %v270_v10 }
  0xb8   :  { %v171_v11 = vpop.f32.mrf.mxu0 }
  0xb9   :  { %v172_v15 = vadd.f32 %v810_v44, %v171_v11 }
  0xbb   :  { %v242_v18 = vmax.f32 %v172_v15, 0.0 }
  0xbd   :  { %v213_v15 = vpop.f32.mrf.mxu3 }
  0xc0   :  { %v173_v16 = vpop.f32.mrf.mxu0 }
  0xc1   :  { %v174_v17 = vadd.f32 %v810_v44, %v173_v16 }
  0xc3   :  { %v243_v19 = vmax.f32 %v174_v17, 0.0 }
  0xc5   :  { %v271_v20 = vpack.c.bf16 %v243_v19, %v242_v18  ;;  %v207_v18 = vadd.f32 %v810_v44, %v206_v54  ;;  %v209_v19 = vadd.f32 %v810_v44, %v208_v62 }
  0xc7   :  { %375 = vmatmul.bf16.gmra.mxu1 %v271_v20  ;;  %v256_v23 = vmax.f32 %v207_v18, 0.0  ;;  %v257_v24 = vmax.f32 %v209_v19, 0.0 }
  0xc8   :  { %v176_v21 = vpop.f32.mrf.mxu0 }
  0xc9   :  { %v177_v25 = vadd.f32 %v810_v44, %v176_v21 }
  0xcb   :  { %v244_v28 = vmax.f32 %v177_v25, 0.0 }
  0xd0   :  { %v178_v26 = vpop.f32.mrf.mxu0 }
  0xd1   :  { %v179_v27 = vadd.f32 %v810_v44, %v178_v26 }
  0xd3   :  { %v245_v29 = vmax.f32 %v179_v27, 0.0  ;;  %v216_v27 = vpop.f32.mrf.mxu3 }
  0xd5   :  { %v272_v30 = vpack.c.bf16 %v245_v29, %v244_v28  ;;  %v278_v28 = vpack.c.bf16 %v257_v24, %v256_v23 }
  0xd7   :  { %380 = vmatmul.bf16.gmra.mxu1 %v272_v30 }
  0xd8   :  { %v181_v31 = vpop.f32.mrf.mxu0 }
  0xd9   :  { %v182_v32 = vadd.f32 %v810_v44, %v181_v31  ;;  %v212_v31 = vadd.f32 %v810_v44, %v211_v8 }
  0xdb   :  { %v246_v35 = vmax.f32 %v182_v32, 0.0  ;;  %v214_v32 = vadd.f32 %v810_v44, %v213_v15 }
  0xe0   :  { %v183_v33 = vpop.f32.mrf.mxu0 }
  0xe1   :  { %v184_v34 = vadd.f32 %v810_v44, %v183_v33 }
  0xe3   :  { %v247_v36 = vmax.f32 %v184_v34, 0.0  ;;  %v218_v34 = vpop.f32.mrf.mxu3 }
  0xe5   :  { %v273_v37 = vpack.c.bf16 %v247_v36, %v246_v35 }
  0xe7   :  { %385 = vmatmul.bf16.gmra.mxu1 %v273_v37  ;;  %v258_v37 = vmax.f32 %v212_v31, 0.0 }
  0xe8   :  { %v186_v38 = vpop.f32.mrf.mxu0 }
  0xe9   :  { %v187_v39 = vadd.f32 %v810_v44, %v186_v38  ;;  %v259_v38 = vmax.f32 %v214_v32, 0.0 }
  0xeb   :  { %v248_v42 = vmax.f32 %v187_v39, 0.0 }
  0xf0   :  { %v188_v40 = vpop.f32.mrf.mxu0 }
  0xf1   :  { %v189_v41 = vadd.f32 %v810_v44, %v188_v40 }
  0xf3   :  { %v249_v43 = vmax.f32 %v189_v41, 0.0  ;;  %v279_v41 = vpack.c.bf16 %v259_v38, %v258_v37 }
  0xf5   :  { %v274_v45 = vpack.c.bf16 %v249_v43, %v248_v42  ;;  %v221_v42 = vpop.f32.mrf.mxu3 }
  0xf7   :  { %390 = vmatmul.bf16.gmra.mxu1 %v274_v45 }
  0xf8   :  { %v191_v46 = vpop.f32.mrf.mxu0 }
  0xf9   :  { %v192_v47 = vadd.f32 %v810_v44, %v191_v46  ;;  %v217_v46 = vadd.f32 %v810_v44, %v216_v27 }
  0xfb   :  { %v250_v50 = vmax.f32 %v192_v47, 0.0  ;;  %v219_v47 = vadd.f32 %v810_v44, %v218_v34 }
  0xfd   :  { %v223_v54 = vpop.f32.mrf.mxu3 }
 0x100   :  { %v193_v48 = vpop.f32.mrf.mxu0 }
 0x101   :  { %v194_v49 = vadd.f32 %v810_v44, %v193_v48 }
 0x103   :  { %v251_v51 = vmax.f32 %v194_v49, 0.0 }
 0x105   :  { %v275_v52 = vpack.c.bf16 %v251_v51, %v250_v50  ;;  %v260_v51 = vmax.f32 %v217_v46, 0.0 }
 0x107   :  { %395 = vmatmul.bf16.gmra.mxu1 %v275_v52  ;;  %v261_v52 = vmax.f32 %v219_v47, 0.0 }
 0x108   :  { %v196_v53 = vpop.f32.mrf.mxu0 }
 0x109   :  { %v197_v55 = vadd.f32 %v810_v44, %v196_v53 }
 0x10b   :  { %v252_v58 = vmax.f32 %v197_v55, 0.0 }
 0x110   :  { %v198_v56 = vpop.f32.mrf.mxu0 }
 0x111   :  { %v199_v57 = vadd.f32 %v810_v44, %v198_v56  ;;  %v280_v56 = vpack.c.bf16 %v261_v52, %v260_v51 }
 0x113   :  { %v253_v59 = vmax.f32 %v199_v57, 0.0 }
 0x114   :  { %v361_v60 = vpop.f32.mrf.mxu1 }
 0x115   :  { %v276_v61 = vpack.c.bf16 %v253_v59, %v252_v58  ;;  %v362_v1 = vadd.f32 %v870_v63, %v361_v60  ;;  %v226_v59 = vpop.f32.mrf.mxu3  ;;  %v222_v60 = vadd.f32 %v810_v44, %v221_v42 }
 0x117   :  { %400 = vmatmul.bf16.gmra.mxu1 %v276_v61  ;;  %v441_v4 = vmax.f32 %v362_v1, 0.0  ;;  %v224_v61 = vadd.f32 %v810_v44, %v223_v54 }
 0x118   :  { %v201_v0 = vpop.f32.mrf.mxu0 }
 0x119   :  { %v202_v5 = vadd.f32 %v810_v44, %v201_v0 }
 0x11b   :  { %v254_v11 = vmax.f32 %v202_v5, 0.0 }
 0x11c   :  { %v363_v2 = vpop.f32.mrf.mxu1 }
 0x11d   :  { %v364_v3 = vadd.f32 %v870_v63, %v363_v2  ;;  %v262_v2 = vmax.f32 %v222_v60, 0.0 }
 0x11f   :  { %v442_v6 = vmax.f32 %v364_v3, 0.0  ;;  %v263_v3 = vmax.f32 %v224_v61, 0.0 }
 0x120   :  { %v203_v7 = vpop.f32.mrf.mxu0 }
 0x121   :  { %v204_v9 = vadd.f32 %v810_v44, %v203_v7  ;;  %v876_v10 = vpack.c.bf16 %v442_v6, %v441_v4  ;;  %v281_v6 = vpack.c.bf16 %v263_v3, %v262_v2  ;;  %v228_v7 = vpop.f32.mrf.mxu3 }
 0x123   :  { %v255_v12 = vmax.f32 %v204_v9, 0.0  ;;  %v227_v9 = vadd.f32 %v810_v44, %v226_v59 }
 0x124   :  { %v366_v13 = vpop.f32.mrf.mxu1 }
 0x125   :  { %v277_v14 = vpack.c.bf16 %v255_v12, %v254_v11  ;;  %v367_v16 = vadd.f32 %v870_v63, %v366_v13  ;;  %v229_v11 = vadd.f32 %v810_v44, %v228_v7  ;;  %v264_v13 = vmax.f32 %v227_v9, 0.0 }
 0x127   :  { %405 = vmatmul.bf16.vlgmr.msra.gmra.mxu2 %v277_v14  ;;  %v443_v21 = vmax.f32 %v367_v16, 0.0  ;;  %v265_v14 = vmax.f32 %v229_v11, 0.0 }
 0x129   :  { %v231_v12 = vpop.f32.mrf.mxu3  ;;  %v282_v16 = vpack.c.bf16 %v265_v14, %v264_v13 }
 0x12a   :  { %v232_v19 = vadd.f32 %v810_v44, %v231_v12 }
 0x12c   :  { %v368_v17 = vpop.f32.mrf.mxu1 }
 0x12d   :  { %v369_v20 = vadd.f32 %v870_v63, %v368_v17 }
 0x12f   :  { %v444_v22 = vmax.f32 %v369_v20, 0.0 }
 0x131   :  { %v882_v25 = vpack.c.bf16 %v444_v22, %v443_v21  ;;  %v233_v17 = vpop.f32.mrf.mxu3  ;;  %v266_v21 = vmax.f32 %v232_v19, 0.0 }
 0x132   :  { %v234_v20 = vadd.f32 %v810_v44, %v233_v17 }
 0x134   :  { %v371_v26 = vpop.f32.mrf.mxu1  ;;  %v267_v22 = vmax.f32 %v234_v20, 0.0 }
 0x135   :  { %v372_v29 = vadd.f32 %v870_v63, %v371_v26 }
 0x136   :  { %v283_v24 = vpack.c.bf16 %v267_v22, %v266_v21 }
 0x137   :  { %410 = vmatmul.bf16.gmra.mxu2 %v278_v28  ;;  %v445_v35 = vmax.f32 %v372_v29, 0.0 }
 0x13c   :  { %v373_v30 = vpop.f32.mrf.mxu1 }
 0x13d   :  { %v374_v33 = vadd.f32 %v870_v63, %v373_v30 }
 0x13f   :  { %v446_v36 = vmax.f32 %v374_v33, 0.0 }
 0x141   :  { %v888_v39 = vpack.c.bf16 %v446_v36, %v445_v35 }
 0x144   :  { %v376_v40 = vpop.f32.mrf.mxu1 }
 0x145   :  { %v377_v43 = vadd.f32 %v870_v63, %v376_v40 }
 0x147   :  { %415 = vmatmul.bf16.gmra.mxu2 %v279_v41  ;;  %v447_v49 = vmax.f32 %v377_v43, 0.0 }
 0x14c   :  { %v378_v45 = vpop.f32.mrf.mxu1 }
 0x14d   :  { %v379_v48 = vadd.f32 %v870_v63, %v378_v45 }
 0x14f   :  { %v448_v50 = vmax.f32 %v379_v48, 0.0 }
 0x151   :  { %v476_v53 = vpack.c.bf16 %v448_v50, %v447_v49 }
 0x154   :  { %v381_v55 = vpop.f32.mrf.mxu1 }
 0x155   :  { %v382_v57 = vadd.f32 %v870_v63, %v381_v55 }
 0x157   :  { %420 = vmatmul.bf16.gmra.mxu2 %v280_v56  ;;  %v449_v0 = vmax.f32 %v382_v57, 0.0 }
 0x15c   :  { %v383_v58 = vpop.f32.mrf.mxu1 }
 0x15d   :  { %v384_v62 = vadd.f32 %v870_v63, %v383_v58 }
 0x15f   :  { %v450_v1 = vmax.f32 %v384_v62, 0.0 }
 0x161   :  { %v477_v4 = vpack.c.bf16 %v450_v1, %v449_v0 }
 0x164   :  { %v386_v5 = vpop.f32.mrf.mxu1 }
 0x165   :  { %v387_v37 = vadd.f32 %v870_v63, %v386_v5 }
 0x167   :  { %425 = vmatmul.bf16.gmra.mxu2 %v281_v6  ;;  %v451_v40 = vmax.f32 %v387_v37, 0.0 }
 0x16c   :  { %v388_v8 = vpop.f32.mrf.mxu1 }
 0x16d   :  { %v389_v35 = vadd.f32 %v870_v63, %v388_v8 }
 0x16f   :  { %v452_v38 = vmax.f32 %v389_v35, 0.0 }
 0x171   :  { %v478_v41 = vpack.c.bf16 %v452_v38, %v451_v40 }
 0x174   :  { %v391_v15 = vpop.f32.mrf.mxu1 }
 0x175   :  { %v392_v33 = vadd.f32 %v870_v63, %v391_v15 }
 0x177   :  { %430 = vmatmul.bf16.gmra.mxu2 %v282_v16  ;;  %v453_v44 = vmax.f32 %v392_v33, 0.0 }
 0x17c   :  { %v393_v18 = vpop.f32.mrf.mxu1 }
 0x17d   :  { %v394_v31 = vadd.f32 %v870_v63, %v393_v18 }
 0x17f   :  { %v454_v34 = vmax.f32 %v394_v31, 0.0 }
 0x181   :  { %v479_v36 = vpack.c.bf16 %v454_v34, %v453_v44 }
 0x184   :  { %v396_v23 = vpop.f32.mrf.mxu1 }
 0x185   :  { %v397_v26 = vadd.f32 %v870_v63, %v396_v23 }
 0x187   :  { %435 = vmatmul.bf16.gmra.mxu2 %v283_v24  ;;  %v455_v29 = vmax.f32 %v397_v26, 0.0 }
 0x18c   :  { %v398_v27 = vpop.f32.mrf.mxu1 }
 0x18d   :  { %v399_v28 = vadd.f32 %v870_v63, %v398_v27 }
 0x18f   :  { %v456_v30 = vmax.f32 %v399_v28, 0.0  ;;  %v489_v28 = vld [vmem:[%s938_s5] sm:$0x1]  ;;  %s658_s5 = smov [#allocation3]  }
 0x190   :  { %s539_s1 = sshll.u32 %s658_s5, 4  ;;  %s540_s1 = int_to_ptr.vmem [resolvable:$true] %s539_s1 }
 0x191   :  { %v480_v32 = vpack.c.bf16 %v456_v30, %v455_v29  ;;  %v490_v29 = vld [vmem:[#allocation2] sm:$0x1]  ;;  %v657_v30 = vmov 0  }
 0x192   :  { %628 = vset.pattern.permute.xlu0 %v657_v30 }
 0x193   :  { %497 = vmatpush.bf16.xpose.msrb.mxu2 %v480_v32  ;;  %493 = vperm.xlu0 %628, %v490_v29  }
 0x194   :  { %v401_v31 = vpop.f32.mrf.mxu1 }
 0x195   :  { %v402_v34 = vadd.f32 %v870_v63, %v401_v31 }
 0x197   :  { %v457_v35 = vmax.f32 %v402_v34, 0.0 }
 0x19b   :  { %498 = vmatpush.bf16.xpose.msrb.mxu2 %v479_v36 }
 0x19c   :  { %v403_v32 = vpop.f32.mrf.mxu1 }
 0x19d   :  { %v404_v33 = vadd.f32 %v870_v63, %v403_v32 }
 0x19f   :  { %v458_v44 = vmax.f32 %v404_v33, 0.0 }
 0x1a1   :  { %v481_v36 = vpack.c.bf16 %v458_v44, %v457_v35 }
 0x1a3   :  { %499 = vmatpush.bf16.xpose.msrb.mxu2 %v478_v41 }
 0x1aa   :  { %v406_v42 = vpop.f32.mrf.mxu2 }
 0x1ab   :  { %500 = vmatpush.bf16.xpose.msrb.mxu2 %v477_v4  ;;  %v407_v43 = vadd.f32 %v870_v63, %v406_v42  ;;  %v529_v42 = vlaneseq }
 0x1ad   :  { %v459_v47 = vmax.f32 %v407_v43, 0.0  ;;  %vm531_vm2 = vcmp.lt.s32.totalorder %v529_v42, 256 }
 0x1b2   :  { %v408_v45 = vpop.f32.mrf.mxu2 }
 0x1b3   :  { %v409_v46 = vadd.f32 %v870_v63, %v408_v45  ;;  %501 = vmatpush.bf16.xpose.msrb.mxu2 %v476_v53 }
 0x1b5   :  { %v460_v48 = vmax.f32 %v409_v46, 0.0 }
 0x1b7   :  { %v482_v49 = vpack.c.bf16 %v460_v48, %v459_v47 }
 0x1ba   :  { %v411_v50 = vpop.f32.mrf.mxu2 }
 0x1bb   :  { %502 = vmatpush.bf16.xpose.msrb.mxu2 %v888_v39  ;;  %v412_v51 = vadd.f32 %v870_v63, %v411_v50 }
 0x1bd   :  { %v461_v55 = vmax.f32 %v412_v51, 0.0 }
 0x1c2   :  { %v413_v52 = vpop.f32.mrf.mxu2 }
 0x1c3   :  { %v414_v54 = vadd.f32 %v870_v63, %v413_v52  ;;  %503 = vmatpush.bf16.xpose.msrb.mxu2 %v882_v25 }
 0x1c5   :  { %v462_v56 = vmax.f32 %v414_v54, 0.0 }
 0x1c7   :  { %v483_v57 = vpack.c.bf16 %v462_v56, %v461_v55 }
 0x1ca   :  { %v416_v58 = vpop.f32.mrf.mxu2 }
 0x1cb   :  { %504 = vmatpush.bf16.xpose.msrb.mxu2 %v876_v10  ;;  %v417_v53 = vadd.f32 %v870_v63, %v416_v58 }
 0x1cd   :  { %v463_v61 = vmax.f32 %v417_v53, 0.0 }
 0x1d2   :  { %v418_v59 = vpop.f32.mrf.mxu2  ;;  %505 = vmatmul.bf16.vlgmr.msrb.gmra.mxu2 %v489_v28 }
 0x1d3   :  { %v419_v60 = vadd.f32 %v870_v63, %v418_v59 }
 0x1d5   :  { %v464_v39 = vmax.f32 %v419_v60, 0.0 }
 0x1d7   :  { %v484_v62 = vpack.c.bf16 %v464_v39, %v463_v61 }
 0x1da   :  { %v421_v0 = vpop.f32.mrf.mxu2 }
 0x1db   :  { %v422_v1 = vadd.f32 %v870_v63, %v421_v0 }
 0x1dd   :  { %v465_v3 = vmax.f32 %v422_v1, 0.0 }
 0x1e2   :  { %v423_v2 = vpop.f32.mrf.mxu2 }
 0x1e3   :  { %v424_v25 = vadd.f32 %v870_v63, %v423_v2 }
 0x1e5   :  { %v466_v4 = vmax.f32 %v424_v25, 0.0 }
 0x1e7   :  { %v485_v5 = vpack.c.bf16 %v466_v4, %v465_v3 }
 0x1ea   :  { %v426_v6 = vpop.f32.mrf.mxu2 }
 0x1eb   :  { %v427_v23 = vadd.f32 %v870_v63, %v426_v6 }
 0x1ed   :  { %v467_v26 = vmax.f32 %v427_v23, 0.0 }
 0x1f2   :  { %v428_v7 = vpop.f32.mrf.mxu2 }
 0x1f3   :  { %v429_v21 = vadd.f32 %v870_v63, %v428_v7 }
 0x1f5   :  { %v468_v24 = vmax.f32 %v429_v21, 0.0 }
 0x1f7   :  { %v486_v27 = vpack.c.bf16 %v468_v24, %v467_v26 }
 0x1fa   :  { %v431_v10 = vpop.f32.mrf.mxu2 }
 0x1fb   :  { %v432_v18 = vadd.f32 %v870_v63, %v431_v10 }
 0x1fd   :  { %v469_v20 = vmax.f32 %v432_v18, 0.0 }
 0x202   :  { %v433_v8 = vpop.f32.mrf.mxu2 }
 0x203   :  { %v434_v16 = vadd.f32 %v870_v63, %v433_v8 }
 0x205   :  { %v470_v19 = vmax.f32 %v434_v16, 0.0  ;;  %v494_v40 = vpop.permute.xlu0 %493 }
 0x206   :  { %v496_v41 = vperm.slane %v494_v40, 0 }
 0x207   :  { %v487_v22 = vpack.c.bf16 %v470_v19, %v469_v20 }
 0x20a   :  { %v436_v9 = vpop.f32.mrf.mxu2 }
 0x20b   :  { %v437_v11 = vadd.f32 %v870_v63, %v436_v9 }
 0x20d   :  { %v471_v14 = vmax.f32 %v437_v11, 0.0 }
 0x212   :  { %v438_v12 = vpop.f32.mrf.mxu2 }
 0x213   :  { %v439_v13 = vadd.f32 %v870_v63, %v438_v12 }
 0x215   :  { %v472_v15 = vmax.f32 %v439_v13, 0.0 }
 0x217   :  { %v488_v17 = vpack.c.bf16 %v472_v15, %v471_v14 }
 0x219   :  { %510 = vmatpush.bf16.xpose.msrb.mxu3 %v488_v17 }
 0x221   :  { %511 = vmatpush.bf16.xpose.msrb.mxu3 %v487_v22 }
 0x229   :  { %512 = vmatpush.bf16.xpose.msrb.mxu3 %v486_v27 }
 0x231   :  { %513 = vmatpush.bf16.xpose.msrb.mxu3 %v485_v5 }
 0x239   :  { %514 = vmatpush.bf16.xpose.msrb.mxu3 %v484_v62 }
 0x241   :  { %515 = vmatpush.bf16.xpose.msrb.mxu3 %v483_v57 }
 0x249   :  { %516 = vmatpush.bf16.xpose.msrb.mxu3 %v482_v49 }
 0x251   :  { %517 = vmatpush.bf16.xpose.msrb.mxu3 %v481_v36 }
 0x255   :  { %v506_v37 = vpop.f32.mrf.mxu2 }
 0x256   :  { %v507_v63 = vadd.f32 %v506_v37, %v496_v41 }
 0x258   :  { %518 = vmatmul.bf16.vlgmr.msrb.gmra.mxu3 %v489_v28 }
 0x25d   :  { %v508_v38 = vpop.f32.mrf.mxu2 }
 0x2db   :  { %v519_v43 = vpop.f32.mrf.mxu3 }
 0x2dc   :  { %v520_v45 = vadd.f32 %v519_v43, %v496_v41 }
 0x2de   :  { %v525_v46 = vrot.slane %v520_v45, 7 }
 0x2e0   :  { %v527_v47 = vsel %vm526_vm1, %v507_v63, %v525_v46 }
 0x2e1   :  { %533 = vst.msk [vmem:[#allocation3] sm:$0x3] %vm531_vm2, %v527_v47 }
 0x2e2   :  { %544 = dma.vmem_to_hbm [thread:$0]  %s540_s1, 32, %s542_s14, [#allocation4]  }
 0x2e3   :  { %v521_v48 = vpop.f32.mrf.mxu3 }
 0x2e4   :  { %655 = dma.done.wait [#allocation4], 32  }
 0x2e5   :  { %656 = vsyncadd [#allocation4], 4294967264 }
 0x2e6   :  { %549 = vsyncpa [#allocation4], 1 }

</bundles_post_ra>
